<compile_context>
chip_gen: v5e
topology: v5e:2x2
jax: 0.10.0
libtpu: 0.0.40
codegen_flags: <defaults>
</compile_context>

<pallas_src>
import functools
import math

import jax
import jax.numpy as jnp
from jax import lax
from jax.experimental import pallas as pl
from jax.experimental.pallas import tpu as pltpu

# ---------------- model configuration ---------------------------------------
ROI_SIZE = (18, 18, 18)                         # roi_size from len/stride helper
KERNEL = (16, 16, 16)
OUT_CHAN = 4
CONV_OUT_SPATIAL = tuple(ROI_SIZE[i] - KERNEL[i] + 1 for i in range(3))   # (3,3,3)
N_POS = int(math.prod(CONV_OUT_SPATIAL))                                   # 27
CONV_OUT_FLAT = OUT_CHAN * N_POS                                           # 108
HIDDEN = CONV_OUT_FLAT // 2 + 1                                            # 55
N_OUT = 3
IN_FLAT = int(math.prod(ROI_SIZE))                                         # 5832
LANE = 128
SUBLANE = 8


def _round_up(x, m):
    return (x + m - 1) // m * m


# ---------------- fused Pallas kernel ----------------------------------------
def _fused_net_kernel(x_ref, w0_ref, w1_ref, w2_ref, b_ref, out_ref):
    # x:   (bt, 5832)    raw ROI, flattened (d, h, w) row-major
    # w0:  (5832, 128)   conv-as-dense matrix; cols = pos*4 + chan, zero padded
    # w1:  (128, 128)    fc1 weights, rows permuted to (pos, chan) order, zero padded
    # w2:  (128, 128)    output weights, zero padded
    # b:   (8, 128)      row 0: conv bias (per pos,chan), row 1: fc1 bias, row 2: out bias
    # out: (bt, 128)     lane-dense store; columns 0..2 hold the real outputs
    x = x_ref[...]
    h0 = jnp.dot(x, w0_ref[...], preferred_element_type=jnp.float32)
    h0 = h0 + b_ref[0:1, :]
    h0 = jnp.where(h0 > 0, h0, 0.01 * h0)          # leaky_relu (padded lanes stay 0)
    h1 = jnp.dot(h0, w1_ref[...], preferred_element_type=jnp.float32)
    h1 = h1 + b_ref[1:2, :]
    h1 = jnp.where(h1 > 0, h1, 0.01 * h1)          # leaky_relu
    out_ref[...] = (
        jnp.dot(h1, w2_ref[...], preferred_element_type=jnp.float32) + b_ref[2:3, :]
    )


def net_forward(x, kernel_params, *, block_b=128):
    """x: (B, D, H, W) float32 (implicit channel dim of 1). Returns (B, 3)."""
    if x.ndim == 3:                                # match module's unsqueeze behavior
        x = x[None]
    if x.ndim == 5:                                # (B, 1, D, H, W)
        x = x[:, 0]
    w0, w1p, w2p, bpack = kernel_params

    b = x.shape[0]
    x_flat = x.reshape(b, IN_FLAT).astype(w0.dtype)

    bt = min(block_b, _round_up(b, SUBLANE))       # batch tile (multiple of 8)
    b_pad = _round_up(b, bt)
    if b_pad != b:
        x_flat = jnp.pad(x_flat, ((0, b_pad - b), (0, 0)))

    out = pl.pallas_call(
        _fused_net_kernel,
        out_shape=jax.ShapeDtypeStruct((b_pad, LANE), jnp.float32),
        grid_spec=pltpu.PrefetchScalarGridSpec(
            num_scalar_prefetch=0,
            grid=(b_pad // bt,),
            in_specs=[
                pl.BlockSpec((bt, IN_FLAT), lambda i: (i, 0)),       # batch tile of x
                pl.BlockSpec((IN_FLAT, LANE), lambda i: (0, 0)),     # weights: constant
                pl.BlockSpec((LANE, LANE), lambda i: (0, 0)),
                pl.BlockSpec((LANE, LANE), lambda i: (0, 0)),
                pl.BlockSpec((SUBLANE, LANE), lambda i: (0, 0)),     # packed biases
            ],
            out_specs=pl.BlockSpec((bt, LANE), lambda i: (i, 0)),
        ),
        compiler_params=pltpu.CompilerParams(
            dimension_semantics=("parallel",),       # 2-TC sharding on v7x
            vmem_limit_bytes=32 * 1024 * 1024,       # bounded for v7x's 64 MiB VMEM
        ),
    )(x_flat, w0, w1p, w2p, bpack)
    return out[:b, :N_OUT]


# ---------------- offline parameter preparation ------------------------------
def prepare_params(raw_params, dtype=jnp.float32):
    """Transform PyTorch-layout params into fused, lane-padded kernel tensors."""
    w_conv, b_conv, w1, b1, w2, b2 = raw_params
    # w_conv: (4,16,16,16), b_conv: (4,), w1: (55,108), b1: (55,), w2: (3,55), b2: (3,)

    # Conv -> dense matmul over the raw flattened ROI: column (pos*4 + c) of W0
    # is channel-c's kernel shifted to output position pos = od*9 + oh*3 + ow,
    # embedded in the (18,18,18) grid (zeros elsewhere).
    w_dhwc = jnp.transpose(w_conv, (1, 2, 3, 0))                   # (16,16,16,4)
    w0 = jnp.zeros((*ROI_SIZE, N_POS, OUT_CHAN), jnp.float32)
    for od in range(CONV_OUT_SPATIAL[0]):
        for oh in range(CONV_OUT_SPATIAL[1]):
            for ow in range(CONV_OUT_SPATIAL[2]):
                pos = (od * CONV_OUT_SPATIAL[1] + oh) * CONV_OUT_SPATIAL[2] + ow
                w0 = w0.at[od:od + KERNEL[0],
                           oh:oh + KERNEL[1],
                           ow:ow + KERNEL[2], pos, :].set(w_dhwc)
    w0 = w0.reshape(IN_FLAT, CONV_OUT_FLAT)                        # (5832, 108)
    w0 = jnp.pad(w0, ((0, 0), (0, LANE - CONV_OUT_FLAT)))          # (5832, 128)

    # fc1: permute rows from PyTorch's (chan, pos) flatten order to our (pos, chan)
    # order, then zero-pad to (128, 128).  This deletes the runtime transpose.
    perm = jnp.array([(j % OUT_CHAN) * N_POS + j // OUT_CHAN
                      for j in range(CONV_OUT_FLAT)], jnp.int32)
    w1_t = w1.T[perm, :]                                           # (108, 55)
    w1p = jnp.zeros((LANE, LANE), jnp.float32).at[:CONV_OUT_FLAT, :HIDDEN].set(w1_t)

    # output layer, zero padded to (128, 128).
    w2p = jnp.zeros((LANE, LANE), jnp.float32).at[:HIDDEN, :N_OUT].set(w2.T)

    # all three biases packed into one (8, 128) tile (padding lanes are 0, so
    # padded activation columns stay exactly 0 through both leaky_relus).
    bpack = jnp.zeros((SUBLANE, LANE), jnp.float32)
    bpack = bpack.at[0, :CONV_OUT_FLAT].set(jnp.tile(b_conv, N_POS))
    bpack = bpack.at[1, :HIDDEN].set(b1)
    bpack = bpack.at[2, :N_OUT].set(b2)

    return (w0.astype(dtype), w1p.astype(dtype), w2p.astype(dtype), bpack)


# ---------------- deterministic parameter init (PyTorch layout) --------------
def init_params(key):
    k = jax.random.split(key, 6)

    def unif(kk, shape, fan_in):
        bound = 1.0 / math.sqrt(fan_in)
        return jax.random.uniform(kk, shape, jnp.float32, -bound, bound)

    w_conv = unif(k[0], (OUT_CHAN, *KERNEL), math.prod(KERNEL))    # (4,16,16,16)
    b_conv = unif(k[1], (OUT_CHAN,), math.prod(KERNEL))            # (4,)
    w1 = unif(k[2], (HIDDEN, CONV_OUT_FLAT), CONV_OUT_FLAT)        # (55,108)
    b1 = unif(k[3], (HIDDEN,), CONV_OUT_FLAT)                      # (55,)
    w2 = unif(k[4], (N_OUT, HIDDEN), HIDDEN)                       # (3,55)
    b2 = unif(k[5], (N_OUT,), HIDDEN)                              # (3,)
    return (w_conv, b_conv, w1, b1, w2, b2)


# ---------------- pure-JAX reference (PyTorch semantics) ---------------------
def net_forward_ref(x, raw_params):
    w_conv, b_conv, w1, b1, w2, b2 = raw_params
    b = x.shape[0]
    lhs = x[:, None]                                               # (B,1,D,H,W)
    rhs = w_conv[:, None]                                          # (4,1,16,16,16)
    conv = lax.conv_general_dilated(
        lhs, rhs, window_strides=(1, 1, 1), padding="VALID",
        dimension_numbers=("NCDHW", "OIDHW", "NCDHW"))
    conv = conv + b_conv.reshape(1, OUT_CHAN, 1, 1, 1)
    flat = conv.reshape(b, CONV_OUT_FLAT)                          # (c,d,h,w) order
    flat = jnp.where(flat > 0, flat, 0.01 * flat)
    h = flat @ w1.T + b1
    h = jnp.where(h > 0, h, 0.01 * h)
    return h @ w2.T + b2


if __name__ == "__main__":
    key = jax.random.PRNGKey(0)
    kp, kx = jax.random.split(key)
    raw_params = init_params(kp)
    kernel_params = prepare_params(raw_params)

    B = 2
    x = jax.random.normal(kx, (B, *ROI_SIZE), jnp.float32)         # (2, 18, 18, 18)

    fwd = jax.jit(functools.partial(net_forward, block_b=128))
    out = jax.block_until_ready(fwd(x, kernel_params))
    ref = jax.block_until_ready(net_forward_ref(x, raw_params))

    assert out.shape == (B, N_OUT)
    assert jnp.allclose(out, ref, rtol=1e-3, atol=1e-3), (out, ref)
    print("KERNEL_OK")
</pallas_src>

<mosaic_0001>
module attributes {stable_mosaic.version = 11 : i64} {
  func.func @_fused_net_kernel(%arg0: i32, %arg1: memref<8x5832xf32, #tpu.memory_space<vmem>>, %arg2: memref<5832x128xf32, #tpu.memory_space<vmem>>, %arg3: memref<128x128xf32, #tpu.memory_space<vmem>>, %arg4: memref<128x128xf32, #tpu.memory_space<vmem>>, %arg5: memref<8x128xf32, #tpu.memory_space<vmem>>, %arg6: memref<8x128xf32, #tpu.memory_space<vmem>>) attributes {dimension_semantics = [#tpu.dimension_semantics<parallel>], iteration_bounds = array<i64: 1>, scalar_prefetch = 0 : i64, scratch_operands = 0 : i64, tpu.core_type = #tpu.core_type<tc>, window_params = [{transform_indices = @transform_0, window_bounds = array<i64: 8, 5832>}, {pipeline_mode = #tpu.pipeline_mode<synchronous>, transform_indices = @transform_1, window_bounds = array<i64: 5832, 128>}, {pipeline_mode = #tpu.pipeline_mode<synchronous>, transform_indices = @transform_2, window_bounds = array<i64: 128, 128>}, {pipeline_mode = #tpu.pipeline_mode<synchronous>, transform_indices = @transform_3, window_bounds = array<i64: 128, 128>}, {pipeline_mode = #tpu.pipeline_mode<synchronous>, transform_indices = @transform_4, window_bounds = array<i64: 8, 128>}, {transform_indices = @transform_5, window_bounds = array<i64: 8, 128>}]} {
    %c0 = arith.constant 0 : index
    %c0_0 = arith.constant 0 : index
    %0 = vector.load %arg1[%c0, %c0_0] : memref<8x5832xf32, #tpu.memory_space<vmem>>, vector<8x5832xf32>
    %c0_1 = arith.constant 0 : index
    %c0_2 = arith.constant 0 : index
    %1 = vector.load %arg2[%c0_1, %c0_2] : memref<5832x128xf32, #tpu.memory_space<vmem>>, vector<5832x128xf32>
    %cst = arith.constant dense<0.000000e+00> : vector<8x128xf32>
    %2 = tpu.matmul %0, %1, %cst {dimension_numbers = #tpu.dot_dimension_numbers<[1], [0], [0], [1], [0, 0, 1, 1], [], []>} : vector<8x5832xf32>, vector<5832x128xf32>, vector<8x128xf32> -> vector<8x128xf32>
    %c0_3 = arith.constant 0 : index
    %c0_4 = arith.constant 0 : index
    %3 = vector.load %arg5[%c0_3, %c0_4] : memref<8x128xf32, #tpu.memory_space<vmem>>, vector<1x128xf32>
    %4 = vector.broadcast %3 : vector<1x128xf32> to vector<8x128xf32>
    %5 = arith.addf %2, %4 : vector<8x128xf32>
    %cst_5 = arith.constant 0.000000e+00 : f32
    %6 = vector.broadcast %cst_5 : f32 to vector<8x128xf32>
    %7 = arith.cmpf ogt, %5, %6 : vector<8x128xf32>
    %cst_6 = arith.constant 0.00999999977 : f32
    %8 = vector.broadcast %cst_6 : f32 to vector<8x128xf32>
    %9 = arith.mulf %8, %5 : vector<8x128xf32>
    %10 = arith.select %7, %5, %9 : vector<8x128xi1>, vector<8x128xf32>
    %c0_7 = arith.constant 0 : index
    %c0_8 = arith.constant 0 : index
    %11 = vector.load %arg3[%c0_7, %c0_8] : memref<128x128xf32, #tpu.memory_space<vmem>>, vector<128x128xf32>
    %cst_9 = arith.constant dense<0.000000e+00> : vector<8x128xf32>
    %12 = tpu.matmul %10, %11, %cst_9 {dimension_numbers = #tpu.dot_dimension_numbers<[1], [0], [0], [1], [0, 0, 1, 1], [], []>} : vector<8x128xf32>, vector<128x128xf32>, vector<8x128xf32> -> vector<8x128xf32>
    %c1 = arith.constant 1 : index
    %c0_10 = arith.constant 0 : index
    %13 = vector.load %arg5[%c1, %c0_10] : memref<8x128xf32, #tpu.memory_space<vmem>>, vector<1x128xf32>
    %14 = vector.broadcast %13 : vector<1x128xf32> to vector<8x128xf32>
    %15 = arith.addf %12, %14 : vector<8x128xf32>
    %cst_11 = arith.constant 0.000000e+00 : f32
    %16 = vector.broadcast %cst_11 : f32 to vector<8x128xf32>
    %17 = arith.cmpf ogt, %15, %16 : vector<8x128xf32>
    %cst_12 = arith.constant 0.00999999977 : f32
    %18 = vector.broadcast %cst_12 : f32 to vector<8x128xf32>
    %19 = arith.mulf %18, %15 : vector<8x128xf32>
    %20 = arith.select %17, %15, %19 : vector<8x128xi1>, vector<8x128xf32>
    %c0_13 = arith.constant 0 : index
    %c0_14 = arith.constant 0 : index
    %21 = vector.load %arg4[%c0_13, %c0_14] : memref<128x128xf32, #tpu.memory_space<vmem>>, vector<128x128xf32>
    %cst_15 = arith.constant dense<0.000000e+00> : vector<8x128xf32>
    %22 = tpu.matmul %20, %21, %cst_15 {dimension_numbers = #tpu.dot_dimension_numbers<[1], [0], [0], [1], [0, 0, 1, 1], [], []>} : vector<8x128xf32>, vector<128x128xf32>, vector<8x128xf32> -> vector<8x128xf32>
    %c2 = arith.constant 2 : index
    %c0_16 = arith.constant 0 : index
    %23 = vector.load %arg5[%c2, %c0_16] : memref<8x128xf32, #tpu.memory_space<vmem>>, vector<1x128xf32>
    %24 = vector.broadcast %23 : vector<1x128xf32> to vector<8x128xf32>
    %25 = arith.addf %22, %24 : vector<8x128xf32>
    %c0_17 = arith.constant 0 : index
    %c0_18 = arith.constant 0 : index
    %26 = vector.load %arg6[%c0_17, %c0_18] : memref<8x128xf32, #tpu.memory_space<vmem>>, vector<8x128xf32>
    tpu.vector_store %arg6[%c0_17, %c0_18], %25 {strides = array<i32>} : memref<8x128xf32, #tpu.memory_space<vmem>>, vector<8x128xf32>,
    return
  }
  func.func @transform_0(%arg0: i32) -> (i32, i32) {
    %c0_i32 = arith.constant 0 : i32
    %c0_i32_0 = arith.constant 0 : i32
    return %arg0, %c0_i32 : i32, i32
  }
  func.func @transform_1(%arg0: i32) -> (i32, i32) {
    %c0_i32 = arith.constant 0 : i32
    %c0_i32_0 = arith.constant 0 : i32
    %c0_i32_1 = arith.constant 0 : i32
    return %c0_i32, %c0_i32_0 : i32, i32
  }
  func.func @transform_2(%arg0: i32) -> (i32, i32) {
    %c0_i32 = arith.constant 0 : i32
    %c0_i32_0 = arith.constant 0 : i32
    %c0_i32_1 = arith.constant 0 : i32
    return %c0_i32, %c0_i32_0 : i32, i32
  }
  func.func @transform_3(%arg0: i32) -> (i32, i32) {
    %c0_i32 = arith.constant 0 : i32
    %c0_i32_0 = arith.constant 0 : i32
    %c0_i32_1 = arith.constant 0 : i32
    return %c0_i32, %c0_i32_0 : i32, i32
  }
  func.func @transform_4(%arg0: i32) -> (i32, i32) {
    %c0_i32 = arith.constant 0 : i32
    %c0_i32_0 = arith.constant 0 : i32
    %c0_i32_1 = arith.constant 0 : i32
    return %c0_i32, %c0_i32_0 : i32, i32
  }
  func.func @transform_5(%arg0: i32) -> (i32, i32) {
    %c0_i32 = arith.constant 0 : i32
    %c0_i32_0 = arith.constant 0 : i32
    return %arg0, %c0_i32 : i32, i32
  }
}

</mosaic_0001>

<bundles_post_ra>
// kernel: net_forward.1
= control target key start
LH: loop header
LB: loop body
LE: loop exit
PB: predicated region body
PF: predicated region fallthrough
CT: control target
= control target key end

     0   :  { %10 = vsyncpa [#allocation3], 0  ;;  %s2173_s0 = inlined_call_operand.vmem [shape: f32[8,5832], index: 0, kind: input, shape index: {}]   ;;  %s2174_s1 = inlined_call_operand.hbm [shape: f32[5832,128], index: 1, kind: input, shape index: {}]   ;;  %s2175_s2 = inlined_call_operand.hbm [shape: f32[128,128], index: 2, kind: input, shape index: {}]   ;;  %s2176_s3 = inlined_call_operand.hbm [shape: f32[128,128], index: 3, kind: input, shape index: {}]   ;;  %s2177_s4 = inlined_call_operand.hbm [shape: f32[8,128], index: 4, kind: input, shape index: {}]   ;;  %s2178_s5 = inlined_call_operand.vmem [shape: f32[8,128], index: 5, kind: output, shape index: {}]  }
   0x1   :  { %11 = vsyncpa [#allocation5], 0 }
   0x2   :  { %12 = vsyncpa [#allocation8], 0  ;;  %s32_s20 = sshll.u32 %s2175_s2, 4  ;;  %s1984_s21 = smov [#allocation4]   ;;  %s33_s20 = int_to_ptr.hbm [resolvable:$true] %s32_s20 }
   0x3   :  { %s34_s22 = sshll.u32 %s1984_s21, 4  ;;  %s19_s25 = sshll.u32 %s2174_s1, 4  ;;  %s35_s22 = int_to_ptr.vmem [resolvable:$true] %s34_s22  ;;  %s20_s25 = int_to_ptr.hbm [resolvable:$true] %s19_s25 }
   0x4   :  { %s1985_s26 = smov 128   ;;  %s1986_s27 = smov 8  }
   0x5   :  { %40 = dma.hbm_to_vmem [thread:$0]  %s33_s20, 2048, %s35_s22, [#allocation5], %s1985_s26, %s1985_s26, %s1986_s27  }
   0x6   :  { %s1987_s28 = smov [#allocation2]   ;;  %s45_s7 = sshll.u32 %s2176_s3, 4  ;;  %s46_s7 = int_to_ptr.hbm [resolvable:$true] %s45_s7 }
   0x7   :  { %s21_s29 = sshll.u32 %s1987_s28, 4  ;;  %s59_s9 = sshll.u32 %s2177_s4, 4  ;;  %s22_s29 = int_to_ptr.vmem [resolvable:$true] %s21_s29  ;;  %s60_s9 = int_to_ptr.hbm [resolvable:$true] %s59_s9 }
   0x8   :  { %27 = dma.hbm_to_vmem [thread:$0]  %s20_s25, 93312, %s22_s29, [#allocation3], %s1985_s26, %s1985_s26, %s1986_s27  }
   0x9   :  { %s1988_s10 = smov [#allocation6]   ;;  %s1989_s1 = smov [#allocation7]  }
   0xa   :  { %s47_s11 = sshll.u32 %s1988_s10, 4  ;;  %s61_s12 = sshll.u32 %s1989_s1, 4  ;;  %s48_s11 = int_to_ptr.vmem [resolvable:$true] %s47_s11  ;;  %s62_s12 = int_to_ptr.vmem [resolvable:$true] %s61_s12 }
   0xb   :  { %53 = dma.hbm_to_vmem [thread:$0]  %s46_s7, 2048, %s48_s11, [#allocation5], %s1985_s26, %s1985_s26, %s1986_s27  }
   0xc   :  { %64 = dma.hbm_to_vmem [thread:$0]  %s60_s9, 128, %s62_s12, [#allocation8]  }
   0xd   :  { %1978 = dma.done.wait [#allocation3], 93312  }
   0xe   :  { %1979 = vsyncadd [#allocation3], 4294873984 }
   0xf   :  { %1980 = dma.done.wait [#allocation5], 4096  }
  0x10   :  { %1981 = vsyncadd [#allocation5], 4294963200 }
  0x11   :  { %1982 = dma.done.wait [#allocation8], 128  }
  0x12   :  { %1983 = vsyncadd [#allocation8], 4294967168  ;;  %v142_v0 = vld [vmem:[#allocation2 + $0x78] sm:$0xff]  ;;  %v141_v2 = vld [vmem:[#allocation2 + $0x70] sm:$0xff]  ;;  %vm858_vm0 = vcmask 588800  }
  0x13   :  { %v174_v1 = vld [vmem:[#allocation2 + $0x178] sm:$0xff]  ;;  %862 = vmatpush.msra.mxu0 %v142_v0  ;;  %v173_v4 = vld [vmem:[#allocation2 + $0x170] sm:$0xff]  ;;  %v140_v6 = vld [vmem:[#allocation2 + $0x68] sm:$0xff] }
  0x14   :  { %902 = vmatpush.msra.mxu2 %v174_v1  ;;  %v158_v3 = vld [vmem:[#allocation2 + $0xf8] sm:$0xff]  ;;  %v157_v7 = vld [vmem:[#allocation2 + $0xf0] sm:$0xff]  ;;  %v172_v8 = vld [vmem:[#allocation2 + $0x168] sm:$0xff] }
  0x15   :  { %v190_v5 = vld [vmem:[#allocation2 + $0x1f8] sm:$0xff]  ;;  %882 = vmatpush.msra.mxu1 %v158_v3  ;;  %863 = vmatpush.msra.mxu0 %v141_v2  ;;  %v189_v9 = vld [vmem:[#allocation2 + $0x1f0] sm:$0xff]  ;;  %v156_v10 = vld [vmem:[#allocation2 + $0xe8] sm:$0xff] }
  0x16   :  { %922 = vmatpush.msra.mxu3 %v190_v5  ;;  %903 = vmatpush.msra.mxu2 %v173_v4  ;;  %v139_v11 = vld [vmem:[#allocation2 + $0x60] sm:$0xff]  ;;  %v188_v13 = vld [vmem:[#allocation2 + $0x1e8] sm:$0xff]  ;;  %v138_v16 = vld [vmem:[#allocation2 + $0x58] sm:$0xff] }
  0x17   :  { %883 = vmatpush.msra.mxu1 %v157_v7  ;;  %v171_v12 = vld [vmem:[#allocation2 + $0x160] sm:$0xff]  ;;  %864 = vmatpush.msra.mxu0 %v140_v6  ;;  %v170_v17 = vld [vmem:[#allocation2 + $0x158] sm:$0xff]  ;;  %v137_v20 = vld [vmem:[#allocation2 + $0x50] sm:$0xff] }
  0x18   :  { %923 = vmatpush.msra.mxu3 %v189_v9  ;;  %904 = vmatpush.msra.mxu2 %v172_v8  ;;  %v155_v14 = vld [vmem:[#allocation2 + $0xe0] sm:$0xff]  ;;  %v154_v18 = vld [vmem:[#allocation2 + $0xd8] sm:$0xff]  ;;  %v169_v21 = vld [vmem:[#allocation2 + $0x150] sm:$0xff] }
  0x19   :  { %v187_v15 = vld [vmem:[#allocation2 + $0x1e0] sm:$0xff]  ;;  %884 = vmatpush.msra.mxu1 %v156_v10  ;;  %865 = vmatpush.msra.mxu0 %v139_v11  ;;  %v186_v19 = vld [vmem:[#allocation2 + $0x1d8] sm:$0xff]  ;;  %v153_v22 = vld [vmem:[#allocation2 + $0xd0] sm:$0xff] }
  0x1a   :  { %924 = vmatpush.msra.mxu3 %v188_v13  ;;  %905 = vmatpush.msra.mxu2 %v171_v12  ;;  %v185_v23 = vld [vmem:[#allocation2 + $0x1d0] sm:$0xff]  ;;  %v136_v24 = vld [vmem:[#allocation2 + $0x48] sm:$0xff]  ;;  %v135_v28 = vld [vmem:[#allocation2 + $0x40] sm:$0xff] }
  0x1b   :  { %885 = vmatpush.msra.mxu1 %v155_v14  ;;  %866 = vmatpush.msra.mxu0 %v138_v16  ;;  %v168_v25 = vld [vmem:[#allocation2 + $0x148] sm:$0xff]  ;;  %v167_v29 = vld [vmem:[#allocation2 + $0x140] sm:$0xff]  ;;  %v134_v32 = vld [vmem:[#allocation2 + $0x38] sm:$0xff] }
  0x1c   :  { %925 = vmatpush.msra.mxu3 %v187_v15  ;;  %906 = vmatpush.msra.mxu2 %v170_v17  ;;  %v152_v26 = vld [vmem:[#allocation2 + $0xc8] sm:$0xff]  ;;  %v151_v30 = vld [vmem:[#allocation2 + $0xc0] sm:$0xff]  ;;  %v166_v33 = vld [vmem:[#allocation2 + $0x138] sm:$0xff] }
  0x1d   :  { %886 = vmatpush.msra.mxu1 %v154_v18  ;;  %867 = vmatpush.msra.mxu0 %v137_v20  ;;  %v184_v27 = vld [vmem:[#allocation2 + $0x1c8] sm:$0xff]  ;;  %v183_v31 = vld [vmem:[#allocation2 + $0x1c0] sm:$0xff]  ;;  %v150_v34 = vld [vmem:[#allocation2 + $0xb8] sm:$0xff] }
  0x1e   :  { %926 = vmatpush.msra.mxu3 %v186_v19  ;;  %907 = vmatpush.msra.mxu2 %v169_v21  ;;  %v182_v35 = vld [vmem:[#allocation2 + $0x1b8] sm:$0xff]  ;;  %v133_v36 = vld [vmem:[#allocation2 + $0x30] sm:$0xff]  ;;  %v132_v40 = vld [vmem:[#allocation2 + $0x28] sm:$0xff] }
  0x1f   :  { %887 = vmatpush.msra.mxu1 %v153_v22  ;;  %868 = vmatpush.msra.mxu0 %v136_v24  ;;  %v165_v37 = vld [vmem:[#allocation2 + $0x130] sm:$0xff]  ;;  %v164_v41 = vld [vmem:[#allocation2 + $0x128] sm:$0xff]  ;;  %v131_v44 = vld [vmem:[#allocation2 + $0x20] sm:$0xff] }
  0x20   :  { %927 = vmatpush.msra.mxu3 %v185_v23  ;;  %908 = vmatpush.msra.mxu2 %v168_v25  ;;  %v149_v38 = vld [vmem:[#allocation2 + $0xb0] sm:$0xff]  ;;  %v148_v42 = vld [vmem:[#allocation2 + $0xa8] sm:$0xff]  ;;  %v163_v45 = vld [vmem:[#allocation2 + $0x120] sm:$0xff] }
  0x21   :  { %888 = vmatpush.msra.mxu1 %v152_v26  ;;  %869 = vmatpush.msra.mxu0 %v135_v28  ;;  %v181_v39 = vld [vmem:[#allocation2 + $0x1b0] sm:$0xff]  ;;  %v180_v43 = vld [vmem:[#allocation2 + $0x1a8] sm:$0xff]  ;;  %v147_v46 = vld [vmem:[#allocation2 + $0xa0] sm:$0xff] }
  0x22   :  { %928 = vmatpush.msra.mxu3 %v184_v27  ;;  %909 = vmatpush.msra.mxu2 %v167_v29  ;;  %v179_v47 = vld [vmem:[#allocation2 + $0x1a0] sm:$0xff]  ;;  %v130_v48 = vld [vmem:[#allocation2 + $0x18] sm:$0xff]  ;;  %v129_v52 = vld [vmem:[#allocation2 + $0x10] sm:$0xff] }
  0x23   :  { %889 = vmatpush.msra.mxu1 %v151_v30  ;;  %870 = vmatpush.msra.mxu0 %v134_v32  ;;  %v162_v49 = vld [vmem:[#allocation2 + $0x118] sm:$0xff]  ;;  %v161_v53 = vld [vmem:[#allocation2 + $0x110] sm:$0xff]  ;;  %v128_v56 = vld [vmem:[#allocation2 + $0x8] sm:$0xff] }
  0x24   :  { %929 = vmatpush.msra.mxu3 %v183_v31  ;;  %910 = vmatpush.msra.mxu2 %v166_v33  ;;  %v146_v50 = vld [vmem:[#allocation2 + $0x98] sm:$0xff]  ;;  %v145_v54 = vld [vmem:[#allocation2 + $0x90] sm:$0xff]  ;;  %v160_v57 = vld [vmem:[#allocation2 + $0x108] sm:$0xff] }
  0x25   :  { %890 = vmatpush.msra.mxu1 %v150_v34  ;;  %871 = vmatpush.msra.mxu0 %v133_v36  ;;  %v178_v51 = vld [vmem:[#allocation2 + $0x198] sm:$0xff]  ;;  %v177_v55 = vld [vmem:[#allocation2 + $0x190] sm:$0xff]  ;;  %v144_v58 = vld [vmem:[#allocation2 + $0x88] sm:$0xff] }
  0x26   :  { %930 = vmatpush.msra.mxu3 %v182_v35  ;;  %911 = vmatpush.msra.mxu2 %v165_v37  ;;  %v176_v59 = vld [vmem:[#allocation2 + $0x188] sm:$0xff]  ;;  %v127_v60 = vld [vmem:[#allocation2] sm:$0xff]  ;;  %v206_v62 = vld [vmem:[#allocation2 + $0x278] sm:$0xff] }
  0x27   :  { %891 = vmatpush.msra.mxu1 %v149_v38  ;;  %872 = vmatpush.msra.mxu0 %v132_v40  ;;  %v159_v61 = vld [vmem:[#allocation2 + $0x100] sm:$0xff]  ;;  %v238_v63 = vld [vmem:[#allocation2 + $0x378] sm:$0xff]  ;;  %v205_v2 = vld [vmem:[#allocation2 + $0x270] sm:$0xff] }
  0x28   :  { %931 = vmatpush.msra.mxu3 %v181_v39  ;;  %912 = vmatpush.msra.mxu2 %v164_v41  ;;  %v143_v0 = vld [vmem:[#allocation2 + $0x80] sm:$0xff]  ;;  %v222_v3 = vld [vmem:[#allocation2 + $0x2f8] sm:$0xff]  ;;  %v237_v4 = vld [vmem:[#allocation2 + $0x370] sm:$0xff] }
  0x29   :  { %892 = vmatpush.msra.mxu1 %v148_v42  ;;  %873 = vmatpush.msra.mxu0 %v131_v44  ;;  %v175_v1 = vld [vmem:[#allocation2 + $0x180] sm:$0xff]  ;;  %v254_v5 = vld [vmem:[#allocation2 + $0x3f8] sm:$0xff]  ;;  %v204_v6 = vld [vmem:[#allocation2 + $0x268] sm:$0xff] }
  0x2a   :  { %932 = vmatpush.msra.mxu3 %v180_v43  ;;  %913 = vmatpush.msra.mxu2 %v163_v45  ;;  %v221_v7 = vld [vmem:[#allocation2 + $0x2f0] sm:$0xff]  ;;  %v236_v8 = vld [vmem:[#allocation2 + $0x368] sm:$0xff]  ;;  %v203_v10 = vld [vmem:[#allocation2 + $0x260] sm:$0xff] }
  0x2b   :  { %893 = vmatpush.msra.mxu1 %v147_v46  ;;  %874 = vmatpush.msra.mxu0 %v130_v48  ;;  %v253_v9 = vld [vmem:[#allocation2 + $0x3f0] sm:$0xff]  ;;  %v220_v11 = vld [vmem:[#allocation2 + $0x2e8] sm:$0xff]  ;;  %v235_v12 = vld [vmem:[#allocation2 + $0x360] sm:$0xff] }
  0x2c   :  { %933 = vmatpush.msra.mxu3 %v179_v47  ;;  %914 = vmatpush.msra.mxu2 %v162_v49  ;;  %v252_v13 = vld [vmem:[#allocation2 + $0x3e8] sm:$0xff]  ;;  %v202_v14 = vld [vmem:[#allocation2 + $0x258] sm:$0xff]  ;;  %v219_v15 = vld [vmem:[#allocation2 + $0x2e0] sm:$0xff] }
  0x2d   :  { %894 = vmatpush.msra.mxu1 %v146_v50  ;;  %875 = vmatpush.msra.mxu0 %v129_v52  ;;  %v234_v16 = vld [vmem:[#allocation2 + $0x358] sm:$0xff]  ;;  %v251_v17 = vld [vmem:[#allocation2 + $0x3e0] sm:$0xff]  ;;  %v201_v18 = vld [vmem:[#allocation2 + $0x250] sm:$0xff] }
  0x2e   :  { %934 = vmatpush.msra.mxu3 %v178_v51  ;;  %915 = vmatpush.msra.mxu2 %v161_v53  ;;  %v218_v19 = vld [vmem:[#allocation2 + $0x2d8] sm:$0xff]  ;;  %v233_v20 = vld [vmem:[#allocation2 + $0x350] sm:$0xff]  ;;  %v200_v22 = vld [vmem:[#allocation2 + $0x248] sm:$0xff] }
  0x2f   :  { %895 = vmatpush.msra.mxu1 %v145_v54  ;;  %876 = vmatpush.msra.mxu0 %v128_v56  ;;  %v250_v21 = vld [vmem:[#allocation2 + $0x3d8] sm:$0xff]  ;;  %v217_v23 = vld [vmem:[#allocation2 + $0x2d0] sm:$0xff]  ;;  %v232_v24 = vld [vmem:[#allocation2 + $0x348] sm:$0xff] }
  0x30   :  { %935 = vmatpush.msra.mxu3 %v177_v55  ;;  %916 = vmatpush.msra.mxu2 %v160_v57  ;;  %v249_v25 = vld [vmem:[#allocation2 + $0x3d0] sm:$0xff]  ;;  %v199_v26 = vld [vmem:[#allocation2 + $0x240] sm:$0xff]  ;;  %v216_v27 = vld [vmem:[#allocation2 + $0x2c8] sm:$0xff] }
  0x31   :  { %896 = vmatpush.msra.mxu1 %v144_v58  ;;  %877 = vmatpush.msra.mxu0 %v127_v60  ;;  %v231_v28 = vld [vmem:[#allocation2 + $0x340] sm:$0xff]  ;;  %v248_v29 = vld [vmem:[#allocation2 + $0x3c8] sm:$0xff]  ;;  %v198_v30 = vld [vmem:[#allocation2 + $0x238] sm:$0xff] }
  0x32   :  { %936 = vmatpush.msra.mxu3 %v176_v59  ;;  %917 = vmatpush.msra.mxu2 %v159_v61  ;;  %v215_v31 = vld [vmem:[#allocation2 + $0x2c0] sm:$0xff]  ;;  %v230_v32 = vld [vmem:[#allocation2 + $0x338] sm:$0xff]  ;;  %v197_v34 = vld [vmem:[#allocation2 + $0x230] sm:$0xff] }
  0x33   :  { %942 = vmatpush.msrb.mxu0 %v206_v62  ;;  %897 = vmatpush.msra.mxu1 %v143_v0  ;;  %v247_v33 = vld [vmem:[#allocation2 + $0x3c0] sm:$0xff]  ;;  %v214_v35 = vld [vmem:[#allocation2 + $0x2b8] sm:$0xff]  ;;  %v229_v36 = vld [vmem:[#allocation2 + $0x330] sm:$0xff] }
  0x34   :  { %982 = vmatpush.msrb.mxu2 %v238_v63  ;;  %937 = vmatpush.msra.mxu3 %v175_v1  ;;  %v246_v37 = vld [vmem:[#allocation2 + $0x3b8] sm:$0xff]  ;;  %v196_v38 = vld [vmem:[#allocation2 + $0x228] sm:$0xff]  ;;  %v213_v39 = vld [vmem:[#allocation2 + $0x2b0] sm:$0xff] }
  0x35   :  { %943 = vmatpush.msrb.mxu0 %v205_v2  ;;  %962 = vmatpush.msrb.mxu1 %v222_v3  ;;  %v228_v40 = vld [vmem:[#allocation2 + $0x328] sm:$0xff]  ;;  %v245_v41 = vld [vmem:[#allocation2 + $0x3b0] sm:$0xff]  ;;  %v195_v42 = vld [vmem:[#allocation2 + $0x220] sm:$0xff] }
  0x36   :  { %983 = vmatpush.msrb.mxu2 %v237_v4  ;;  %1002 = vmatpush.msrb.mxu3 %v254_v5  ;;  %v212_v43 = vld [vmem:[#allocation2 + $0x2a8] sm:$0xff]  ;;  %v227_v44 = vld [vmem:[#allocation2 + $0x320] sm:$0xff]  ;;  %v194_v46 = vld [vmem:[#allocation2 + $0x218] sm:$0xff] }
  0x37   :  { %944 = vmatpush.msrb.mxu0 %v204_v6  ;;  %963 = vmatpush.msrb.mxu1 %v221_v7  ;;  %v244_v45 = vld [vmem:[#allocation2 + $0x3a8] sm:$0xff]  ;;  %v211_v47 = vld [vmem:[#allocation2 + $0x2a0] sm:$0xff]  ;;  %v226_v48 = vld [vmem:[#allocation2 + $0x318] sm:$0xff] }
  0x38   :  { %984 = vmatpush.msrb.mxu2 %v236_v8  ;;  %1003 = vmatpush.msrb.mxu3 %v253_v9  ;;  %v243_v49 = vld [vmem:[#allocation2 + $0x3a0] sm:$0xff]  ;;  %v193_v50 = vld [vmem:[#allocation2 + $0x210] sm:$0xff]  ;;  %v210_v51 = vld [vmem:[#allocation2 + $0x298] sm:$0xff] }
  0x39   :  { %945 = vmatpush.msrb.mxu0 %v203_v10  ;;  %964 = vmatpush.msrb.mxu1 %v220_v11  ;;  %v225_v52 = vld [vmem:[#allocation2 + $0x310] sm:$0xff]  ;;  %v242_v53 = vld [vmem:[#allocation2 + $0x398] sm:$0xff]  ;;  %v192_v54 = vld [vmem:[#allocation2 + $0x208] sm:$0xff] }
  0x3a   :  { %985 = vmatpush.msrb.mxu2 %v235_v12  ;;  %1004 = vmatpush.msrb.mxu3 %v252_v13  ;;  %v209_v55 = vld [vmem:[#allocation2 + $0x290] sm:$0xff]  ;;  %v224_v56 = vld [vmem:[#allocation2 + $0x308] sm:$0xff]  ;;  %v191_v59 = vld [vmem:[#allocation2 + $0x200] sm:$0xff] }
  0x3b   :  { %946 = vmatpush.msrb.mxu0 %v202_v14  ;;  %965 = vmatpush.msrb.mxu1 %v219_v15  ;;  %v241_v57 = vld [vmem:[#allocation2 + $0x390] sm:$0xff]  ;;  %v208_v60 = vld [vmem:[#allocation2 + $0x288] sm:$0xff]  ;;  %v223_v61 = vld [vmem:[#allocation2 + $0x300] sm:$0xff] }
  0x3c   :  { %986 = vmatpush.msrb.mxu2 %v234_v16  ;;  %1005 = vmatpush.msrb.mxu3 %v251_v17  ;;  %v83_v58 = vld [vmem:[%s2173_s0 + $0x10] sm:$0xff]  ;;  %v240_v62 = vld [vmem:[#allocation2 + $0x388] sm:$0xff]  ;;  %v81_v63 = vld [vmem:[%s2173_s0] sm:$0xff] }
  0x3d   :  { %947 = vmatpush.msrb.mxu0 %v201_v18  ;;  %966 = vmatpush.msrb.mxu1 %v218_v19  ;;  %v84_v0 = vld [vmem:[%s2173_s0 + $0x18] sm:$0xff]  ;;  %v207_v3 = vld [vmem:[#allocation2 + $0x280] sm:$0xff]  ;;  %v82_v5 = vld [vmem:[%s2173_s0 + $0x8] sm:$0xff] }
  0x3e   :  { %987 = vmatpush.msrb.mxu2 %v233_v20  ;;  %1006 = vmatpush.msrb.mxu3 %v250_v21  ;;  %v270_v1 = vld [vmem:[#allocation2 + $0x478] sm:$0xff]  ;;  %v239_v4 = vld [vmem:[#allocation2 + $0x380] sm:$0xff]  ;;  %v269_v6 = vld [vmem:[#allocation2 + $0x470] sm:$0xff] }
  0x3f   :  { %948 = vmatpush.msrb.mxu0 %v200_v22  ;;  %967 = vmatpush.msrb.mxu1 %v217_v23  ;;  %v302_v2 = vld [vmem:[#allocation2 + $0x578] sm:$0xff]  ;;  %v301_v8 = vld [vmem:[#allocation2 + $0x570] sm:$0xff]  ;;  %v268_v10 = vld [vmem:[#allocation2 + $0x468] sm:$0xff] }
  0x40   :  { %988 = vmatpush.msrb.mxu2 %v232_v24  ;;  %1007 = vmatpush.msrb.mxu3 %v249_v25  ;;  %v286_v7 = vld [vmem:[#allocation2 + $0x4f8] sm:$0xff]  ;;  %v285_v11 = vld [vmem:[#allocation2 + $0x4f0] sm:$0xff]  ;;  %v300_v12 = vld [vmem:[#allocation2 + $0x568] sm:$0xff] }
  0x41   :  { %949 = vmatpush.msrb.mxu0 %v199_v26  ;;  %968 = vmatpush.msrb.mxu1 %v216_v27  ;;  %v318_v9 = vld [vmem:[#allocation2 + $0x5f8] sm:$0xff]  ;;  %v317_v13 = vld [vmem:[#allocation2 + $0x5f0] sm:$0xff]  ;;  %v267_v15 = vld [vmem:[#allocation2 + $0x460] sm:$0xff] }
  0x42   :  { %989 = vmatpush.msrb.mxu2 %v231_v28  ;;  %1008 = vmatpush.msrb.mxu3 %v248_v29  ;;  %v87_v14 = vld [vmem:[%s2173_s0 + $0x30] sm:$0xff]  ;;  %v284_v16 = vld [vmem:[#allocation2 + $0x4e8] sm:$0xff]  ;;  %v299_v17 = vld [vmem:[#allocation2 + $0x560] sm:$0xff] }
  0x43   :  { %950 = vmatpush.msrb.mxu0 %v198_v30  ;;  %969 = vmatpush.msrb.mxu1 %v215_v31  ;;  %v316_v18 = vld [vmem:[#allocation2 + $0x5e8] sm:$0xff]  ;;  %v85_v19 = vld [vmem:[%s2173_s0 + $0x20] sm:$0xff]  ;;  %v88_v20 = vld [vmem:[%s2173_s0 + $0x38] sm:$0xff] }
  0x44   :  { %990 = vmatpush.msrb.mxu2 %v230_v32  ;;  %1009 = vmatpush.msrb.mxu3 %v247_v33  ;;  %v266_v21 = vld [vmem:[#allocation2 + $0x458] sm:$0xff]  ;;  %v283_v22 = vld [vmem:[#allocation2 + $0x4e0] sm:$0xff]  ;;  %v86_v25 = vld [vmem:[%s2173_s0 + $0x28] sm:$0xff] }
  0x45   :  { %951 = vmatpush.msrb.mxu0 %v197_v34  ;;  %970 = vmatpush.msrb.mxu1 %v214_v35  ;;  %v298_v23 = vld [vmem:[#allocation2 + $0x558] sm:$0xff]  ;;  %v315_v24 = vld [vmem:[#allocation2 + $0x5e0] sm:$0xff]  ;;  %v265_v26 = vld [vmem:[#allocation2 + $0x450] sm:$0xff] }
  0x46   :  { %991 = vmatpush.msrb.mxu2 %v229_v36  ;;  %1010 = vmatpush.msrb.mxu3 %v246_v37  ;;  %v282_v27 = vld [vmem:[#allocation2 + $0x4d8] sm:$0xff]  ;;  %v297_v28 = vld [vmem:[#allocation2 + $0x550] sm:$0xff]  ;;  %v264_v30 = vld [vmem:[#allocation2 + $0x448] sm:$0xff] }
  0x47   :  { %952 = vmatpush.msrb.mxu0 %v196_v38  ;;  %971 = vmatpush.msrb.mxu1 %v213_v39  ;;  %v314_v29 = vld [vmem:[#allocation2 + $0x5d8] sm:$0xff]  ;;  %v281_v31 = vld [vmem:[#allocation2 + $0x4d0] sm:$0xff]  ;;  %v296_v32 = vld [vmem:[#allocation2 + $0x548] sm:$0xff] }
  0x48   :  { %992 = vmatpush.msrb.mxu2 %v228_v40  ;;  %1011 = vmatpush.msrb.mxu3 %v245_v41  ;;  %v313_v33 = vld [vmem:[#allocation2 + $0x5d0] sm:$0xff]  ;;  %v263_v34 = vld [vmem:[#allocation2 + $0x440] sm:$0xff]  ;;  %v280_v35 = vld [vmem:[#allocation2 + $0x4c8] sm:$0xff] }
  0x49   :  { %953 = vmatpush.msrb.mxu0 %v195_v42  ;;  %972 = vmatpush.msrb.mxu1 %v212_v43  ;;  %v295_v36 = vld [vmem:[#allocation2 + $0x540] sm:$0xff]  ;;  %v312_v37 = vld [vmem:[#allocation2 + $0x5c8] sm:$0xff]  ;;  %v262_v38 = vld [vmem:[#allocation2 + $0x438] sm:$0xff] }
  0x4a   :  { %993 = vmatpush.msrb.mxu2 %v227_v44  ;;  %1012 = vmatpush.msrb.mxu3 %v244_v45  ;;  %v279_v39 = vld [vmem:[#allocation2 + $0x4c0] sm:$0xff]  ;;  %v294_v40 = vld [vmem:[#allocation2 + $0x538] sm:$0xff]  ;;  %v261_v42 = vld [vmem:[#allocation2 + $0x430] sm:$0xff] }
  0x4b   :  { %954 = vmatpush.msrb.mxu0 %v194_v46  ;;  %973 = vmatpush.msrb.mxu1 %v211_v47  ;;  %v311_v41 = vld [vmem:[#allocation2 + $0x5c0] sm:$0xff]  ;;  %v278_v43 = vld [vmem:[#allocation2 + $0x4b8] sm:$0xff]  ;;  %v293_v44 = vld [vmem:[#allocation2 + $0x530] sm:$0xff] }
  0x4c   :  { %994 = vmatpush.msrb.mxu2 %v226_v48  ;;  %1013 = vmatpush.msrb.mxu3 %v243_v49  ;;  %v310_v45 = vld [vmem:[#allocation2 + $0x5b8] sm:$0xff]  ;;  %v260_v46 = vld [vmem:[#allocation2 + $0x428] sm:$0xff]  ;;  %v277_v47 = vld [vmem:[#allocation2 + $0x4b0] sm:$0xff] }
  0x4d   :  { %955 = vmatpush.msrb.mxu0 %v193_v50  ;;  %974 = vmatpush.msrb.mxu1 %v210_v51  ;;  %v292_v48 = vld [vmem:[#allocation2 + $0x528] sm:$0xff]  ;;  %v309_v49 = vld [vmem:[#allocation2 + $0x5b0] sm:$0xff]  ;;  %v259_v50 = vld [vmem:[#allocation2 + $0x420] sm:$0xff] }
  0x4e   :  { %995 = vmatpush.msrb.mxu2 %v225_v52  ;;  %1014 = vmatpush.msrb.mxu3 %v242_v53  ;;  %v276_v51 = vld [vmem:[#allocation2 + $0x4a8] sm:$0xff]  ;;  %v291_v52 = vld [vmem:[#allocation2 + $0x520] sm:$0xff] }
  0x4f   :  { %956 = vmatpush.msrb.mxu0 %v192_v54  ;;  %975 = vmatpush.msrb.mxu1 %v209_v55  ;;  %v308_v53 = vld [vmem:[#allocation2 + $0x5a8] sm:$0xff]  ;;  %v258_v54 = vld [vmem:[#allocation2 + $0x418] sm:$0xff]  ;;  %v275_v55 = vld [vmem:[#allocation2 + $0x4a0] sm:$0xff] }
  0x50   :  { %996 = vmatpush.msrb.mxu2 %v224_v56  ;;  %1015 = vmatpush.msrb.mxu3 %v241_v57  ;;  %v290_v56 = vld [vmem:[#allocation2 + $0x518] sm:$0xff]  ;;  %v307_v57 = vld [vmem:[#allocation2 + $0x5a0] sm:$0xff] }
  0x51   :  { %918 = vmatmul.f32.vlgmr.msra.gmra.mxu2 %v83_v58  ;;  %957 = vmatpush.msrb.mxu0 %v191_v59  ;;  %v257_v58 = vld [vmem:[#allocation2 + $0x410] sm:$0xff]  ;;  %v274_v59 = vld [vmem:[#allocation2 + $0x498] sm:$0xff] }
  0x52   :  { %976 = vmatpush.msrb.mxu1 %v208_v60  ;;  %997 = vmatpush.msrb.mxu2 %v223_v61  ;;  %v289_v60 = vld [vmem:[#allocation2 + $0x510] sm:$0xff]  ;;  %v306_v61 = vld [vmem:[#allocation2 + $0x598] sm:$0xff] }
  0x53   :  { %1016 = vmatpush.msrb.mxu3 %v240_v62  ;;  %878 = vmatmul.f32.vlgmr.msra.gmra.mxu0 %v81_v63  ;;  %v256_v62 = vld [vmem:[#allocation2 + $0x408] sm:$0xff]  ;;  %v273_v63 = vld [vmem:[#allocation2 + $0x490] sm:$0xff] }
  0x54   :  { %938 = vmatmul.f32.vlgmr.msra.gmra.mxu3 %v84_v0  ;;  %1022 = vmatpush.msra.mxu0 %v270_v1  ;;  %v288_v0 = vld [vmem:[#allocation2 + $0x508] sm:$0xff]  ;;  %v305_v1 = vld [vmem:[#allocation2 + $0x590] sm:$0xff] }
  0x55   :  { %1062 = vmatpush.msra.mxu2 %v302_v2  ;;  %977 = vmatpush.msrb.mxu1 %v207_v3  ;;  %v255_v2 = vld [vmem:[#allocation2 + $0x400] sm:$0xff]  ;;  %v272_v3 = vld [vmem:[#allocation2 + $0x488] sm:$0xff] }
  0x56   :  { %1017 = vmatpush.msrb.mxu3 %v239_v4  ;;  %898 = vmatmul.f32.vlgmr.msra.gmra.mxu1 %v82_v5  ;;  %v287_v4 = vld [vmem:[#allocation2 + $0x500] sm:$0xff]  ;;  %v304_v5 = vld [vmem:[#allocation2 + $0x588] sm:$0xff] }
  0x57   :  { %1023 = vmatpush.msra.mxu0 %v269_v6  ;;  %1042 = vmatpush.msra.mxu1 %v286_v7  ;;  %v89_v6 = vld [vmem:[%s2173_s0 + $0x40] sm:$0xff]  ;;  %v91_v7 = vld [vmem:[%s2173_s0 + $0x50] sm:$0xff] }
  0x58   :  { %1063 = vmatpush.msra.mxu2 %v301_v8  ;;  %1082 = vmatpush.msra.mxu3 %v318_v9  ;;  %v334_v8 = vld [vmem:[#allocation2 + $0x678] sm:$0xff] }
  0x59   :  { %1024 = vmatpush.msra.mxu0 %v268_v10  ;;  %1043 = vmatpush.msra.mxu1 %v285_v11  ;;  %v366_v9 = vld [vmem:[#allocation2 + $0x778] sm:$0xff]  ;;  %v271_v10 = vld [vmem:[#allocation2 + $0x480] sm:$0xff] }
  0x5a   :  { %1064 = vmatpush.msra.mxu2 %v300_v12  ;;  %1083 = vmatpush.msra.mxu3 %v317_v13  ;;  %v303_v11 = vld [vmem:[#allocation2 + $0x580] sm:$0xff]  ;;  %v90_v12 = vld [vmem:[%s2173_s0 + $0x48] sm:$0xff]  ;;  %v92_v13 = vld [vmem:[%s2173_s0 + $0x58] sm:$0xff] }
  0x5b   :  { %998 = vmatmul.f32.vlgmr.msrb.gmra.mxu2 %v87_v14  ;;  %1025 = vmatpush.msra.mxu0 %v267_v15  ;;  %v333_v14 = vld [vmem:[#allocation2 + $0x670] sm:$0xff]  ;;  %v350_v15 = vld [vmem:[#allocation2 + $0x6f8] sm:$0xff] }
  0x5c   :  { %1044 = vmatpush.msra.mxu1 %v284_v16  ;;  %1065 = vmatpush.msra.mxu2 %v299_v17  ;;  %v365_v16 = vld [vmem:[#allocation2 + $0x770] sm:$0xff]  ;;  %v382_v17 = vld [vmem:[#allocation2 + $0x7f8] sm:$0xff] }
  0x5d   :  { %1084 = vmatpush.msra.mxu3 %v316_v18  ;;  %958 = vmatmul.f32.vlgmr.msrb.gmra.mxu0 %v85_v19  ;;  %v332_v18 = vld [vmem:[#allocation2 + $0x668] sm:$0xff]  ;;  %v349_v19 = vld [vmem:[#allocation2 + $0x6f0] sm:$0xff] }
  0x5e   :  { %1018 = vmatmul.f32.vlgmr.msrb.gmra.mxu3 %v88_v20  ;;  %1026 = vmatpush.msra.mxu0 %v266_v21  ;;  %v364_v20 = vld [vmem:[#allocation2 + $0x768] sm:$0xff]  ;;  %v381_v21 = vld [vmem:[#allocation2 + $0x7f0] sm:$0xff] }
  0x5f   :  { %1045 = vmatpush.msra.mxu1 %v283_v22  ;;  %1066 = vmatpush.msra.mxu2 %v298_v23  ;;  %v331_v22 = vld [vmem:[#allocation2 + $0x660] sm:$0xff]  ;;  %v348_v23 = vld [vmem:[#allocation2 + $0x6e8] sm:$0xff] }
  0x60   :  { %1085 = vmatpush.msra.mxu3 %v315_v24  ;;  %978 = vmatmul.f32.vlgmr.msrb.gmra.mxu1 %v86_v25  ;;  %v363_v24 = vld [vmem:[#allocation2 + $0x760] sm:$0xff]  ;;  %v380_v25 = vld [vmem:[#allocation2 + $0x7e8] sm:$0xff] }
  0x61   :  { %1027 = vmatpush.msra.mxu0 %v265_v26  ;;  %1046 = vmatpush.msra.mxu1 %v282_v27  ;;  %v330_v26 = vld [vmem:[#allocation2 + $0x658] sm:$0xff]  ;;  %v347_v27 = vld [vmem:[#allocation2 + $0x6e0] sm:$0xff] }
  0x62   :  { %1067 = vmatpush.msra.mxu2 %v297_v28  ;;  %1086 = vmatpush.msra.mxu3 %v314_v29  ;;  %v362_v28 = vld [vmem:[#allocation2 + $0x758] sm:$0xff]  ;;  %v379_v29 = vld [vmem:[#allocation2 + $0x7e0] sm:$0xff] }
  0x63   :  { %1028 = vmatpush.msra.mxu0 %v264_v30  ;;  %1047 = vmatpush.msra.mxu1 %v281_v31  ;;  %v329_v30 = vld [vmem:[#allocation2 + $0x650] sm:$0xff]  ;;  %v346_v31 = vld [vmem:[#allocation2 + $0x6d8] sm:$0xff] }
  0x64   :  { %1068 = vmatpush.msra.mxu2 %v296_v32  ;;  %1087 = vmatpush.msra.mxu3 %v313_v33  ;;  %v361_v32 = vld [vmem:[#allocation2 + $0x750] sm:$0xff]  ;;  %v378_v33 = vld [vmem:[#allocation2 + $0x7d8] sm:$0xff] }
  0x65   :  { %1029 = vmatpush.msra.mxu0 %v263_v34  ;;  %1048 = vmatpush.msra.mxu1 %v280_v35  ;;  %v328_v34 = vld [vmem:[#allocation2 + $0x648] sm:$0xff]  ;;  %v345_v35 = vld [vmem:[#allocation2 + $0x6d0] sm:$0xff] }
  0x66   :  { %1069 = vmatpush.msra.mxu2 %v295_v36  ;;  %1088 = vmatpush.msra.mxu3 %v312_v37  ;;  %v360_v36 = vld [vmem:[#allocation2 + $0x748] sm:$0xff]  ;;  %v377_v37 = vld [vmem:[#allocation2 + $0x7d0] sm:$0xff] }
  0x67   :  { %1030 = vmatpush.msra.mxu0 %v262_v38  ;;  %1049 = vmatpush.msra.mxu1 %v279_v39  ;;  %v327_v38 = vld [vmem:[#allocation2 + $0x640] sm:$0xff]  ;;  %v344_v39 = vld [vmem:[#allocation2 + $0x6c8] sm:$0xff] }
  0x68   :  { %1070 = vmatpush.msra.mxu2 %v294_v40  ;;  %1089 = vmatpush.msra.mxu3 %v311_v41  ;;  %v359_v40 = vld [vmem:[#allocation2 + $0x740] sm:$0xff]  ;;  %v376_v41 = vld [vmem:[#allocation2 + $0x7c8] sm:$0xff] }
  0x69   :  { %1031 = vmatpush.msra.mxu0 %v261_v42  ;;  %1050 = vmatpush.msra.mxu1 %v278_v43  ;;  %v326_v42 = vld [vmem:[#allocation2 + $0x638] sm:$0xff]  ;;  %v343_v43 = vld [vmem:[#allocation2 + $0x6c0] sm:$0xff] }
  0x6a   :  { %1071 = vmatpush.msra.mxu2 %v293_v44  ;;  %1090 = vmatpush.msra.mxu3 %v310_v45  ;;  %v358_v44 = vld [vmem:[#allocation2 + $0x738] sm:$0xff]  ;;  %v375_v45 = vld [vmem:[#allocation2 + $0x7c0] sm:$0xff] }
  0x6b   :  { %1032 = vmatpush.msra.mxu0 %v260_v46  ;;  %1051 = vmatpush.msra.mxu1 %v277_v47  ;;  %v325_v46 = vld [vmem:[#allocation2 + $0x630] sm:$0xff]  ;;  %v342_v47 = vld [vmem:[#allocation2 + $0x6b8] sm:$0xff] }
  0x6c   :  { %1072 = vmatpush.msra.mxu2 %v292_v48  ;;  %1091 = vmatpush.msra.mxu3 %v309_v49  ;;  %v357_v48 = vld [vmem:[#allocation2 + $0x730] sm:$0xff]  ;;  %v374_v49 = vld [vmem:[#allocation2 + $0x7b8] sm:$0xff] }
  0x6d   :  { %1033 = vmatpush.msra.mxu0 %v259_v50  ;;  %1052 = vmatpush.msra.mxu1 %v276_v51  ;;  %v324_v50 = vld [vmem:[#allocation2 + $0x628] sm:$0xff]  ;;  %v341_v51 = vld [vmem:[#allocation2 + $0x6b0] sm:$0xff] }
  0x6e   :  { %1073 = vmatpush.msra.mxu2 %v291_v52  ;;  %1092 = vmatpush.msra.mxu3 %v308_v53  ;;  %v356_v52 = vld [vmem:[#allocation2 + $0x728] sm:$0xff]  ;;  %v373_v53 = vld [vmem:[#allocation2 + $0x7b0] sm:$0xff] }
  0x6f   :  { %1034 = vmatpush.msra.mxu0 %v258_v54  ;;  %1053 = vmatpush.msra.mxu1 %v275_v55  ;;  %v323_v54 = vld [vmem:[#allocation2 + $0x620] sm:$0xff]  ;;  %v340_v55 = vld [vmem:[#allocation2 + $0x6a8] sm:$0xff] }
  0x70   :  { %1074 = vmatpush.msra.mxu2 %v290_v56  ;;  %1093 = vmatpush.msra.mxu3 %v307_v57  ;;  %v355_v56 = vld [vmem:[#allocation2 + $0x720] sm:$0xff]  ;;  %v372_v57 = vld [vmem:[#allocation2 + $0x7a8] sm:$0xff] }
  0x71   :  { %1035 = vmatpush.msra.mxu0 %v257_v58  ;;  %1054 = vmatpush.msra.mxu1 %v274_v59  ;;  %v322_v58 = vld [vmem:[#allocation2 + $0x618] sm:$0xff]  ;;  %v339_v59 = vld [vmem:[#allocation2 + $0x6a0] sm:$0xff] }
  0x72   :  { %1075 = vmatpush.msra.mxu2 %v289_v60  ;;  %1094 = vmatpush.msra.mxu3 %v306_v61  ;;  %v354_v60 = vld [vmem:[#allocation2 + $0x718] sm:$0xff]  ;;  %v371_v61 = vld [vmem:[#allocation2 + $0x7a0] sm:$0xff] }
  0x73   :  { %1036 = vmatpush.msra.mxu0 %v256_v62  ;;  %1055 = vmatpush.msra.mxu1 %v273_v63  ;;  %v321_v62 = vld [vmem:[#allocation2 + $0x610] sm:$0xff]  ;;  %v338_v63 = vld [vmem:[#allocation2 + $0x698] sm:$0xff] }
  0x74   :  { %1076 = vmatpush.msra.mxu2 %v288_v0  ;;  %1095 = vmatpush.msra.mxu3 %v305_v1  ;;  %v353_v0 = vld [vmem:[#allocation2 + $0x710] sm:$0xff]  ;;  %v370_v1 = vld [vmem:[#allocation2 + $0x798] sm:$0xff] }
  0x75   :  { %1037 = vmatpush.msra.mxu0 %v255_v2  ;;  %1056 = vmatpush.msra.mxu1 %v272_v3  ;;  %v320_v2 = vld [vmem:[#allocation2 + $0x608] sm:$0xff]  ;;  %v337_v3 = vld [vmem:[#allocation2 + $0x690] sm:$0xff] }
  0x76   :  { %1077 = vmatpush.msra.mxu2 %v287_v4  ;;  %1096 = vmatpush.msra.mxu3 %v304_v5  ;;  %v352_v4 = vld [vmem:[#allocation2 + $0x708] sm:$0xff]  ;;  %v369_v5 = vld [vmem:[#allocation2 + $0x790] sm:$0xff] }
  0x77   :  { %1038 = vmatmul.f32.vlgmr.msra.gmra.mxu0 %v89_v6  ;;  %1078 = vmatmul.f32.vlgmr.msra.gmra.mxu2 %v91_v7  ;;  %v319_v6 = vld [vmem:[#allocation2 + $0x600] sm:$0xff]  ;;  %v336_v7 = vld [vmem:[#allocation2 + $0x688] sm:$0xff] }
  0x78   :  { %1102 = vmatpush.msrb.mxu0 %v334_v8  ;;  %1142 = vmatpush.msrb.mxu2 %v366_v9  ;;  %v351_v8 = vld [vmem:[#allocation2 + $0x700] sm:$0xff]  ;;  %v368_v9 = vld [vmem:[#allocation2 + $0x788] sm:$0xff] }
  0x79   :  { %1057 = vmatpush.msra.mxu1 %v271_v10  ;;  %1097 = vmatpush.msra.mxu3 %v303_v11  ;;  %v93_v10 = vld [vmem:[%s2173_s0 + $0x60] sm:$0xff]  ;;  %v95_v11 = vld [vmem:[%s2173_s0 + $0x70] sm:$0xff] }
  0x7a   :  { %1058 = vmatmul.f32.vlgmr.msra.gmra.mxu1 %v90_v12  ;;  %1098 = vmatmul.f32.vlgmr.msra.gmra.mxu3 %v92_v13  ;;  %v398_v12 = vld [vmem:[#allocation2 + $0x878] sm:$0xff] }
  0x7b   :  { %1103 = vmatpush.msrb.mxu0 %v333_v14  ;;  %1122 = vmatpush.msrb.mxu1 %v350_v15  ;;  %v430_v13 = vld [vmem:[#allocation2 + $0x978] sm:$0xff]  ;;  %v335_v14 = vld [vmem:[#allocation2 + $0x680] sm:$0xff] }
  0x7c   :  { %1143 = vmatpush.msrb.mxu2 %v365_v16  ;;  %1162 = vmatpush.msrb.mxu3 %v382_v17  ;;  %v367_v15 = vld [vmem:[#allocation2 + $0x780] sm:$0xff]  ;;  %v94_v16 = vld [vmem:[%s2173_s0 + $0x68] sm:$0xff]  ;;  %v96_v17 = vld [vmem:[%s2173_s0 + $0x78] sm:$0xff] }
  0x7d   :  { %1104 = vmatpush.msrb.mxu0 %v332_v18  ;;  %1123 = vmatpush.msrb.mxu1 %v349_v19  ;;  %v397_v18 = vld [vmem:[#allocation2 + $0x870] sm:$0xff]  ;;  %v414_v19 = vld [vmem:[#allocation2 + $0x8f8] sm:$0xff] }
  0x7e   :  { %1144 = vmatpush.msrb.mxu2 %v364_v20  ;;  %1163 = vmatpush.msrb.mxu3 %v381_v21  ;;  %v429_v20 = vld [vmem:[#allocation2 + $0x970] sm:$0xff]  ;;  %v446_v21 = vld [vmem:[#allocation2 + $0x9f8] sm:$0xff] }
  0x7f   :  { %1105 = vmatpush.msrb.mxu0 %v331_v22  ;;  %1124 = vmatpush.msrb.mxu1 %v348_v23  ;;  %v396_v22 = vld [vmem:[#allocation2 + $0x868] sm:$0xff]  ;;  %v413_v23 = vld [vmem:[#allocation2 + $0x8f0] sm:$0xff] }
  0x80   :  { %1145 = vmatpush.msrb.mxu2 %v363_v24  ;;  %1164 = vmatpush.msrb.mxu3 %v380_v25  ;;  %v428_v24 = vld [vmem:[#allocation2 + $0x968] sm:$0xff]  ;;  %v445_v25 = vld [vmem:[#allocation2 + $0x9f0] sm:$0xff] }
  0x81   :  { %1106 = vmatpush.msrb.mxu0 %v330_v26  ;;  %1125 = vmatpush.msrb.mxu1 %v347_v27  ;;  %v395_v26 = vld [vmem:[#allocation2 + $0x860] sm:$0xff]  ;;  %v412_v27 = vld [vmem:[#allocation2 + $0x8e8] sm:$0xff] }
  0x82   :  { %1146 = vmatpush.msrb.mxu2 %v362_v28  ;;  %1165 = vmatpush.msrb.mxu3 %v379_v29  ;;  %v427_v28 = vld [vmem:[#allocation2 + $0x960] sm:$0xff]  ;;  %v444_v29 = vld [vmem:[#allocation2 + $0x9e8] sm:$0xff] }
  0x83   :  { %1107 = vmatpush.msrb.mxu0 %v329_v30  ;;  %1126 = vmatpush.msrb.mxu1 %v346_v31  ;;  %v394_v30 = vld [vmem:[#allocation2 + $0x858] sm:$0xff]  ;;  %v411_v31 = vld [vmem:[#allocation2 + $0x8e0] sm:$0xff] }
  0x84   :  { %1147 = vmatpush.msrb.mxu2 %v361_v32  ;;  %1166 = vmatpush.msrb.mxu3 %v378_v33  ;;  %v426_v32 = vld [vmem:[#allocation2 + $0x958] sm:$0xff]  ;;  %v443_v33 = vld [vmem:[#allocation2 + $0x9e0] sm:$0xff] }
  0x85   :  { %1108 = vmatpush.msrb.mxu0 %v328_v34  ;;  %1127 = vmatpush.msrb.mxu1 %v345_v35  ;;  %v393_v34 = vld [vmem:[#allocation2 + $0x850] sm:$0xff]  ;;  %v410_v35 = vld [vmem:[#allocation2 + $0x8d8] sm:$0xff] }
  0x86   :  { %1148 = vmatpush.msrb.mxu2 %v360_v36  ;;  %1167 = vmatpush.msrb.mxu3 %v377_v37  ;;  %v425_v36 = vld [vmem:[#allocation2 + $0x950] sm:$0xff]  ;;  %v442_v37 = vld [vmem:[#allocation2 + $0x9d8] sm:$0xff] }
  0x87   :  { %1109 = vmatpush.msrb.mxu0 %v327_v38  ;;  %1128 = vmatpush.msrb.mxu1 %v344_v39  ;;  %v392_v38 = vld [vmem:[#allocation2 + $0x848] sm:$0xff]  ;;  %v409_v39 = vld [vmem:[#allocation2 + $0x8d0] sm:$0xff] }
  0x88   :  { %1149 = vmatpush.msrb.mxu2 %v359_v40  ;;  %1168 = vmatpush.msrb.mxu3 %v376_v41  ;;  %v424_v40 = vld [vmem:[#allocation2 + $0x948] sm:$0xff]  ;;  %v441_v41 = vld [vmem:[#allocation2 + $0x9d0] sm:$0xff] }
  0x89   :  { %1110 = vmatpush.msrb.mxu0 %v326_v42  ;;  %1129 = vmatpush.msrb.mxu1 %v343_v43  ;;  %v391_v42 = vld [vmem:[#allocation2 + $0x840] sm:$0xff]  ;;  %v408_v43 = vld [vmem:[#allocation2 + $0x8c8] sm:$0xff] }
  0x8a   :  { %1150 = vmatpush.msrb.mxu2 %v358_v44  ;;  %1169 = vmatpush.msrb.mxu3 %v375_v45  ;;  %v423_v44 = vld [vmem:[#allocation2 + $0x940] sm:$0xff]  ;;  %v440_v45 = vld [vmem:[#allocation2 + $0x9c8] sm:$0xff] }
  0x8b   :  { %1111 = vmatpush.msrb.mxu0 %v325_v46  ;;  %1130 = vmatpush.msrb.mxu1 %v342_v47  ;;  %v390_v46 = vld [vmem:[#allocation2 + $0x838] sm:$0xff]  ;;  %v407_v47 = vld [vmem:[#allocation2 + $0x8c0] sm:$0xff] }
  0x8c   :  { %1151 = vmatpush.msrb.mxu2 %v357_v48  ;;  %1170 = vmatpush.msrb.mxu3 %v374_v49  ;;  %v422_v48 = vld [vmem:[#allocation2 + $0x938] sm:$0xff]  ;;  %v439_v49 = vld [vmem:[#allocation2 + $0x9c0] sm:$0xff] }
  0x8d   :  { %1112 = vmatpush.msrb.mxu0 %v324_v50  ;;  %1131 = vmatpush.msrb.mxu1 %v341_v51  ;;  %v389_v50 = vld [vmem:[#allocation2 + $0x830] sm:$0xff]  ;;  %v406_v51 = vld [vmem:[#allocation2 + $0x8b8] sm:$0xff] }
  0x8e   :  { %1152 = vmatpush.msrb.mxu2 %v356_v52  ;;  %1171 = vmatpush.msrb.mxu3 %v373_v53  ;;  %v421_v52 = vld [vmem:[#allocation2 + $0x930] sm:$0xff]  ;;  %v438_v53 = vld [vmem:[#allocation2 + $0x9b8] sm:$0xff] }
  0x8f   :  { %1113 = vmatpush.msrb.mxu0 %v323_v54  ;;  %1132 = vmatpush.msrb.mxu1 %v340_v55  ;;  %v388_v54 = vld [vmem:[#allocation2 + $0x828] sm:$0xff]  ;;  %v405_v55 = vld [vmem:[#allocation2 + $0x8b0] sm:$0xff] }
  0x90   :  { %1153 = vmatpush.msrb.mxu2 %v355_v56  ;;  %1172 = vmatpush.msrb.mxu3 %v372_v57  ;;  %v420_v56 = vld [vmem:[#allocation2 + $0x928] sm:$0xff]  ;;  %v437_v57 = vld [vmem:[#allocation2 + $0x9b0] sm:$0xff] }
  0x91   :  { %1114 = vmatpush.msrb.mxu0 %v322_v58  ;;  %1133 = vmatpush.msrb.mxu1 %v339_v59  ;;  %v387_v58 = vld [vmem:[#allocation2 + $0x820] sm:$0xff]  ;;  %v404_v59 = vld [vmem:[#allocation2 + $0x8a8] sm:$0xff] }
  0x92   :  { %1154 = vmatpush.msrb.mxu2 %v354_v60  ;;  %1173 = vmatpush.msrb.mxu3 %v371_v61  ;;  %v419_v60 = vld [vmem:[#allocation2 + $0x920] sm:$0xff]  ;;  %v436_v61 = vld [vmem:[#allocation2 + $0x9a8] sm:$0xff] }
  0x93   :  { %1115 = vmatpush.msrb.mxu0 %v321_v62  ;;  %1134 = vmatpush.msrb.mxu1 %v338_v63  ;;  %v386_v62 = vld [vmem:[#allocation2 + $0x818] sm:$0xff]  ;;  %v403_v63 = vld [vmem:[#allocation2 + $0x8a0] sm:$0xff] }
  0x94   :  { %1155 = vmatpush.msrb.mxu2 %v353_v0  ;;  %1174 = vmatpush.msrb.mxu3 %v370_v1  ;;  %v418_v0 = vld [vmem:[#allocation2 + $0x918] sm:$0xff]  ;;  %v435_v1 = vld [vmem:[#allocation2 + $0x9a0] sm:$0xff] }
  0x95   :  { %1116 = vmatpush.msrb.mxu0 %v320_v2  ;;  %1135 = vmatpush.msrb.mxu1 %v337_v3  ;;  %v385_v2 = vld [vmem:[#allocation2 + $0x810] sm:$0xff]  ;;  %v402_v3 = vld [vmem:[#allocation2 + $0x898] sm:$0xff] }
  0x96   :  { %1156 = vmatpush.msrb.mxu2 %v352_v4  ;;  %1175 = vmatpush.msrb.mxu3 %v369_v5  ;;  %v417_v4 = vld [vmem:[#allocation2 + $0x910] sm:$0xff]  ;;  %v434_v5 = vld [vmem:[#allocation2 + $0x998] sm:$0xff] }
  0x97   :  { %1117 = vmatpush.msrb.mxu0 %v319_v6  ;;  %1136 = vmatpush.msrb.mxu1 %v336_v7  ;;  %v384_v6 = vld [vmem:[#allocation2 + $0x808] sm:$0xff]  ;;  %v401_v7 = vld [vmem:[#allocation2 + $0x890] sm:$0xff] }
  0x98   :  { %1157 = vmatpush.msrb.mxu2 %v351_v8  ;;  %1176 = vmatpush.msrb.mxu3 %v368_v9  ;;  %v416_v8 = vld [vmem:[#allocation2 + $0x908] sm:$0xff]  ;;  %v433_v9 = vld [vmem:[#allocation2 + $0x990] sm:$0xff] }
  0x99   :  { %1118 = vmatmul.f32.vlgmr.msrb.gmra.mxu0 %v93_v10  ;;  %1158 = vmatmul.f32.vlgmr.msrb.gmra.mxu2 %v95_v11  ;;  %v383_v10 = vld [vmem:[#allocation2 + $0x800] sm:$0xff]  ;;  %v400_v11 = vld [vmem:[#allocation2 + $0x888] sm:$0xff] }
  0x9a   :  { %1182 = vmatpush.msra.mxu0 %v398_v12  ;;  %1222 = vmatpush.msra.mxu2 %v430_v13  ;;  %v415_v12 = vld [vmem:[#allocation2 + $0x900] sm:$0xff]  ;;  %v432_v13 = vld [vmem:[#allocation2 + $0x988] sm:$0xff] }
  0x9b   :  { %1137 = vmatpush.msrb.mxu1 %v335_v14  ;;  %1177 = vmatpush.msrb.mxu3 %v367_v15  ;;  %v97_v14 = vld [vmem:[%s2173_s0 + $0x80] sm:$0xff]  ;;  %v99_v15 = vld [vmem:[%s2173_s0 + $0x90] sm:$0xff] }
  0x9c   :  { %1138 = vmatmul.f32.vlgmr.msrb.gmra.mxu1 %v94_v16  ;;  %1178 = vmatmul.f32.vlgmr.msrb.gmra.mxu3 %v96_v17  ;;  %v462_v16 = vld [vmem:[#allocation2 + $0xa78] sm:$0xff] }
  0x9d   :  { %1183 = vmatpush.msra.mxu0 %v397_v18  ;;  %1202 = vmatpush.msra.mxu1 %v414_v19  ;;  %v494_v17 = vld [vmem:[#allocation2 + $0xb78] sm:$0xff]  ;;  %v399_v18 = vld [vmem:[#allocation2 + $0x880] sm:$0xff] }
  0x9e   :  { %1223 = vmatpush.msra.mxu2 %v429_v20  ;;  %1242 = vmatpush.msra.mxu3 %v446_v21  ;;  %v431_v19 = vld [vmem:[#allocation2 + $0x980] sm:$0xff]  ;;  %v98_v20 = vld [vmem:[%s2173_s0 + $0x88] sm:$0xff]  ;;  %v100_v21 = vld [vmem:[%s2173_s0 + $0x98] sm:$0xff] }
  0x9f   :  { %1184 = vmatpush.msra.mxu0 %v396_v22  ;;  %1203 = vmatpush.msra.mxu1 %v413_v23  ;;  %v461_v22 = vld [vmem:[#allocation2 + $0xa70] sm:$0xff]  ;;  %v478_v23 = vld [vmem:[#allocation2 + $0xaf8] sm:$0xff] }
  0xa0   :  { %1224 = vmatpush.msra.mxu2 %v428_v24  ;;  %1243 = vmatpush.msra.mxu3 %v445_v25  ;;  %v493_v24 = vld [vmem:[#allocation2 + $0xb70] sm:$0xff]  ;;  %v510_v25 = vld [vmem:[#allocation2 + $0xbf8] sm:$0xff] }
  0xa1   :  { %1185 = vmatpush.msra.mxu0 %v395_v26  ;;  %1204 = vmatpush.msra.mxu1 %v412_v27  ;;  %v460_v26 = vld [vmem:[#allocation2 + $0xa68] sm:$0xff]  ;;  %v477_v27 = vld [vmem:[#allocation2 + $0xaf0] sm:$0xff] }
  0xa2   :  { %1225 = vmatpush.msra.mxu2 %v427_v28  ;;  %1244 = vmatpush.msra.mxu3 %v444_v29  ;;  %v492_v28 = vld [vmem:[#allocation2 + $0xb68] sm:$0xff]  ;;  %v509_v29 = vld [vmem:[#allocation2 + $0xbf0] sm:$0xff] }
  0xa3   :  { %1186 = vmatpush.msra.mxu0 %v394_v30  ;;  %1205 = vmatpush.msra.mxu1 %v411_v31  ;;  %v459_v30 = vld [vmem:[#allocation2 + $0xa60] sm:$0xff]  ;;  %v476_v31 = vld [vmem:[#allocation2 + $0xae8] sm:$0xff] }
  0xa4   :  { %1226 = vmatpush.msra.mxu2 %v426_v32  ;;  %1245 = vmatpush.msra.mxu3 %v443_v33  ;;  %v491_v32 = vld [vmem:[#allocation2 + $0xb60] sm:$0xff]  ;;  %v508_v33 = vld [vmem:[#allocation2 + $0xbe8] sm:$0xff] }
  0xa5   :  { %1187 = vmatpush.msra.mxu0 %v393_v34  ;;  %1206 = vmatpush.msra.mxu1 %v410_v35  ;;  %v458_v34 = vld [vmem:[#allocation2 + $0xa58] sm:$0xff]  ;;  %v475_v35 = vld [vmem:[#allocation2 + $0xae0] sm:$0xff] }
  0xa6   :  { %1227 = vmatpush.msra.mxu2 %v425_v36  ;;  %1246 = vmatpush.msra.mxu3 %v442_v37  ;;  %v490_v36 = vld [vmem:[#allocation2 + $0xb58] sm:$0xff]  ;;  %v507_v37 = vld [vmem:[#allocation2 + $0xbe0] sm:$0xff] }
  0xa7   :  { %1188 = vmatpush.msra.mxu0 %v392_v38  ;;  %1207 = vmatpush.msra.mxu1 %v409_v39  ;;  %v457_v38 = vld [vmem:[#allocation2 + $0xa50] sm:$0xff]  ;;  %v474_v39 = vld [vmem:[#allocation2 + $0xad8] sm:$0xff] }
  0xa8   :  { %1228 = vmatpush.msra.mxu2 %v424_v40  ;;  %1247 = vmatpush.msra.mxu3 %v441_v41  ;;  %v489_v40 = vld [vmem:[#allocation2 + $0xb50] sm:$0xff]  ;;  %v506_v41 = vld [vmem:[#allocation2 + $0xbd8] sm:$0xff] }
  0xa9   :  { %1189 = vmatpush.msra.mxu0 %v391_v42  ;;  %1208 = vmatpush.msra.mxu1 %v408_v43  ;;  %v456_v42 = vld [vmem:[#allocation2 + $0xa48] sm:$0xff]  ;;  %v473_v43 = vld [vmem:[#allocation2 + $0xad0] sm:$0xff] }
  0xaa   :  { %1229 = vmatpush.msra.mxu2 %v423_v44  ;;  %1248 = vmatpush.msra.mxu3 %v440_v45  ;;  %v488_v44 = vld [vmem:[#allocation2 + $0xb48] sm:$0xff]  ;;  %v505_v45 = vld [vmem:[#allocation2 + $0xbd0] sm:$0xff] }
  0xab   :  { %1190 = vmatpush.msra.mxu0 %v390_v46  ;;  %1209 = vmatpush.msra.mxu1 %v407_v47  ;;  %v455_v46 = vld [vmem:[#allocation2 + $0xa40] sm:$0xff]  ;;  %v472_v47 = vld [vmem:[#allocation2 + $0xac8] sm:$0xff] }
  0xac   :  { %1230 = vmatpush.msra.mxu2 %v422_v48  ;;  %1249 = vmatpush.msra.mxu3 %v439_v49  ;;  %v487_v48 = vld [vmem:[#allocation2 + $0xb40] sm:$0xff]  ;;  %v504_v49 = vld [vmem:[#allocation2 + $0xbc8] sm:$0xff] }
  0xad   :  { %1191 = vmatpush.msra.mxu0 %v389_v50  ;;  %1210 = vmatpush.msra.mxu1 %v406_v51  ;;  %v454_v50 = vld [vmem:[#allocation2 + $0xa38] sm:$0xff]  ;;  %v471_v51 = vld [vmem:[#allocation2 + $0xac0] sm:$0xff] }
  0xae   :  { %1231 = vmatpush.msra.mxu2 %v421_v52  ;;  %1250 = vmatpush.msra.mxu3 %v438_v53  ;;  %v486_v52 = vld [vmem:[#allocation2 + $0xb38] sm:$0xff]  ;;  %v503_v53 = vld [vmem:[#allocation2 + $0xbc0] sm:$0xff] }
  0xaf   :  { %1192 = vmatpush.msra.mxu0 %v388_v54  ;;  %1211 = vmatpush.msra.mxu1 %v405_v55  ;;  %v453_v54 = vld [vmem:[#allocation2 + $0xa30] sm:$0xff]  ;;  %v470_v55 = vld [vmem:[#allocation2 + $0xab8] sm:$0xff] }
  0xb0   :  { %1232 = vmatpush.msra.mxu2 %v420_v56  ;;  %1251 = vmatpush.msra.mxu3 %v437_v57  ;;  %v485_v56 = vld [vmem:[#allocation2 + $0xb30] sm:$0xff]  ;;  %v502_v57 = vld [vmem:[#allocation2 + $0xbb8] sm:$0xff] }
  0xb1   :  { %1193 = vmatpush.msra.mxu0 %v387_v58  ;;  %1212 = vmatpush.msra.mxu1 %v404_v59  ;;  %v452_v58 = vld [vmem:[#allocation2 + $0xa28] sm:$0xff]  ;;  %v469_v59 = vld [vmem:[#allocation2 + $0xab0] sm:$0xff] }
  0xb2   :  { %1233 = vmatpush.msra.mxu2 %v419_v60  ;;  %1252 = vmatpush.msra.mxu3 %v436_v61  ;;  %v484_v60 = vld [vmem:[#allocation2 + $0xb28] sm:$0xff]  ;;  %v501_v61 = vld [vmem:[#allocation2 + $0xbb0] sm:$0xff] }
  0xb3   :  { %1194 = vmatpush.msra.mxu0 %v386_v62  ;;  %1213 = vmatpush.msra.mxu1 %v403_v63  ;;  %v451_v62 = vld [vmem:[#allocation2 + $0xa20] sm:$0xff]  ;;  %v468_v63 = vld [vmem:[#allocation2 + $0xaa8] sm:$0xff] }
  0xb4   :  { %1234 = vmatpush.msra.mxu2 %v418_v0  ;;  %1253 = vmatpush.msra.mxu3 %v435_v1  ;;  %v483_v0 = vld [vmem:[#allocation2 + $0xb20] sm:$0xff]  ;;  %v500_v1 = vld [vmem:[#allocation2 + $0xba8] sm:$0xff] }
  0xb5   :  { %1195 = vmatpush.msra.mxu0 %v385_v2  ;;  %1214 = vmatpush.msra.mxu1 %v402_v3  ;;  %v450_v2 = vld [vmem:[#allocation2 + $0xa18] sm:$0xff]  ;;  %v467_v3 = vld [vmem:[#allocation2 + $0xaa0] sm:$0xff] }
  0xb6   :  { %1235 = vmatpush.msra.mxu2 %v417_v4  ;;  %1254 = vmatpush.msra.mxu3 %v434_v5  ;;  %v482_v4 = vld [vmem:[#allocation2 + $0xb18] sm:$0xff]  ;;  %v499_v5 = vld [vmem:[#allocation2 + $0xba0] sm:$0xff] }
  0xb7   :  { %1196 = vmatpush.msra.mxu0 %v384_v6  ;;  %1215 = vmatpush.msra.mxu1 %v401_v7  ;;  %v449_v6 = vld [vmem:[#allocation2 + $0xa10] sm:$0xff]  ;;  %v466_v7 = vld [vmem:[#allocation2 + $0xa98] sm:$0xff] }
  0xb8   :  { %1236 = vmatpush.msra.mxu2 %v416_v8  ;;  %1255 = vmatpush.msra.mxu3 %v433_v9  ;;  %v481_v8 = vld [vmem:[#allocation2 + $0xb10] sm:$0xff]  ;;  %v498_v9 = vld [vmem:[#allocation2 + $0xb98] sm:$0xff] }
  0xb9   :  { %1197 = vmatpush.msra.mxu0 %v383_v10  ;;  %1216 = vmatpush.msra.mxu1 %v400_v11  ;;  %v448_v10 = vld [vmem:[#allocation2 + $0xa08] sm:$0xff]  ;;  %v465_v11 = vld [vmem:[#allocation2 + $0xa90] sm:$0xff] }
  0xba   :  { %1237 = vmatpush.msra.mxu2 %v415_v12  ;;  %1256 = vmatpush.msra.mxu3 %v432_v13  ;;  %v480_v12 = vld [vmem:[#allocation2 + $0xb08] sm:$0xff]  ;;  %v497_v13 = vld [vmem:[#allocation2 + $0xb90] sm:$0xff] }
  0xbb   :  { %1198 = vmatmul.f32.vlgmr.msra.gmra.mxu0 %v97_v14  ;;  %1238 = vmatmul.f32.vlgmr.msra.gmra.mxu2 %v99_v15  ;;  %v447_v14 = vld [vmem:[#allocation2 + $0xa00] sm:$0xff]  ;;  %v464_v15 = vld [vmem:[#allocation2 + $0xa88] sm:$0xff] }
  0xbc   :  { %1262 = vmatpush.msrb.mxu0 %v462_v16  ;;  %1302 = vmatpush.msrb.mxu2 %v494_v17  ;;  %v479_v16 = vld [vmem:[#allocation2 + $0xb00] sm:$0xff]  ;;  %v496_v17 = vld [vmem:[#allocation2 + $0xb88] sm:$0xff] }
  0xbd   :  { %1217 = vmatpush.msra.mxu1 %v399_v18  ;;  %1257 = vmatpush.msra.mxu3 %v431_v19  ;;  %v101_v18 = vld [vmem:[%s2173_s0 + $0xa0] sm:$0xff]  ;;  %v103_v19 = vld [vmem:[%s2173_s0 + $0xb0] sm:$0xff] }
  0xbe   :  { %1218 = vmatmul.f32.vlgmr.msra.gmra.mxu1 %v98_v20  ;;  %1258 = vmatmul.f32.vlgmr.msra.gmra.mxu3 %v100_v21  ;;  %v526_v20 = vld [vmem:[#allocation2 + $0xc78] sm:$0xff] }
  0xbf   :  { %1263 = vmatpush.msrb.mxu0 %v461_v22  ;;  %1282 = vmatpush.msrb.mxu1 %v478_v23  ;;  %v558_v21 = vld [vmem:[#allocation2 + $0xd78] sm:$0xff]  ;;  %v463_v22 = vld [vmem:[#allocation2 + $0xa80] sm:$0xff] }
  0xc0   :  { %1303 = vmatpush.msrb.mxu2 %v493_v24  ;;  %1322 = vmatpush.msrb.mxu3 %v510_v25  ;;  %v495_v23 = vld [vmem:[#allocation2 + $0xb80] sm:$0xff]  ;;  %v102_v24 = vld [vmem:[%s2173_s0 + $0xa8] sm:$0xff]  ;;  %v104_v25 = vld [vmem:[%s2173_s0 + $0xb8] sm:$0xff] }
  0xc1   :  { %1264 = vmatpush.msrb.mxu0 %v460_v26  ;;  %1283 = vmatpush.msrb.mxu1 %v477_v27  ;;  %v525_v26 = vld [vmem:[#allocation2 + $0xc70] sm:$0xff]  ;;  %v542_v27 = vld [vmem:[#allocation2 + $0xcf8] sm:$0xff] }
  0xc2   :  { %1304 = vmatpush.msrb.mxu2 %v492_v28  ;;  %1323 = vmatpush.msrb.mxu3 %v509_v29  ;;  %v557_v28 = vld [vmem:[#allocation2 + $0xd70] sm:$0xff]  ;;  %v574_v29 = vld [vmem:[#allocation2 + $0xdf8] sm:$0xff] }
  0xc3   :  { %1265 = vmatpush.msrb.mxu0 %v459_v30  ;;  %1284 = vmatpush.msrb.mxu1 %v476_v31  ;;  %v524_v30 = vld [vmem:[#allocation2 + $0xc68] sm:$0xff]  ;;  %v541_v31 = vld [vmem:[#allocation2 + $0xcf0] sm:$0xff] }
  0xc4   :  { %1305 = vmatpush.msrb.mxu2 %v491_v32  ;;  %1324 = vmatpush.msrb.mxu3 %v508_v33  ;;  %v556_v32 = vld [vmem:[#allocation2 + $0xd68] sm:$0xff]  ;;  %v573_v33 = vld [vmem:[#allocation2 + $0xdf0] sm:$0xff] }
  0xc5   :  { %1266 = vmatpush.msrb.mxu0 %v458_v34  ;;  %1285 = vmatpush.msrb.mxu1 %v475_v35  ;;  %v523_v34 = vld [vmem:[#allocation2 + $0xc60] sm:$0xff]  ;;  %v540_v35 = vld [vmem:[#allocation2 + $0xce8] sm:$0xff] }
  0xc6   :  { %1306 = vmatpush.msrb.mxu2 %v490_v36  ;;  %1325 = vmatpush.msrb.mxu3 %v507_v37  ;;  %v555_v36 = vld [vmem:[#allocation2 + $0xd60] sm:$0xff]  ;;  %v572_v37 = vld [vmem:[#allocation2 + $0xde8] sm:$0xff] }
  0xc7   :  { %1267 = vmatpush.msrb.mxu0 %v457_v38  ;;  %1286 = vmatpush.msrb.mxu1 %v474_v39  ;;  %v522_v38 = vld [vmem:[#allocation2 + $0xc58] sm:$0xff]  ;;  %v539_v39 = vld [vmem:[#allocation2 + $0xce0] sm:$0xff] }
  0xc8   :  { %1307 = vmatpush.msrb.mxu2 %v489_v40  ;;  %1326 = vmatpush.msrb.mxu3 %v506_v41  ;;  %v554_v40 = vld [vmem:[#allocation2 + $0xd58] sm:$0xff]  ;;  %v571_v41 = vld [vmem:[#allocation2 + $0xde0] sm:$0xff] }
  0xc9   :  { %1268 = vmatpush.msrb.mxu0 %v456_v42  ;;  %1287 = vmatpush.msrb.mxu1 %v473_v43  ;;  %v521_v42 = vld [vmem:[#allocation2 + $0xc50] sm:$0xff]  ;;  %v538_v43 = vld [vmem:[#allocation2 + $0xcd8] sm:$0xff] }
  0xca   :  { %1308 = vmatpush.msrb.mxu2 %v488_v44  ;;  %1327 = vmatpush.msrb.mxu3 %v505_v45  ;;  %v553_v44 = vld [vmem:[#allocation2 + $0xd50] sm:$0xff]  ;;  %v570_v45 = vld [vmem:[#allocation2 + $0xdd8] sm:$0xff] }
  0xcb   :  { %1269 = vmatpush.msrb.mxu0 %v455_v46  ;;  %1288 = vmatpush.msrb.mxu1 %v472_v47  ;;  %v520_v46 = vld [vmem:[#allocation2 + $0xc48] sm:$0xff]  ;;  %v537_v47 = vld [vmem:[#allocation2 + $0xcd0] sm:$0xff] }
  0xcc   :  { %1309 = vmatpush.msrb.mxu2 %v487_v48  ;;  %1328 = vmatpush.msrb.mxu3 %v504_v49  ;;  %v552_v48 = vld [vmem:[#allocation2 + $0xd48] sm:$0xff]  ;;  %v569_v49 = vld [vmem:[#allocation2 + $0xdd0] sm:$0xff] }
  0xcd   :  { %1270 = vmatpush.msrb.mxu0 %v454_v50  ;;  %1289 = vmatpush.msrb.mxu1 %v471_v51  ;;  %v519_v50 = vld [vmem:[#allocation2 + $0xc40] sm:$0xff]  ;;  %v536_v51 = vld [vmem:[#allocation2 + $0xcc8] sm:$0xff] }
  0xce   :  { %1310 = vmatpush.msrb.mxu2 %v486_v52  ;;  %1329 = vmatpush.msrb.mxu3 %v503_v53  ;;  %v551_v52 = vld [vmem:[#allocation2 + $0xd40] sm:$0xff]  ;;  %v568_v53 = vld [vmem:[#allocation2 + $0xdc8] sm:$0xff] }
  0xcf   :  { %1271 = vmatpush.msrb.mxu0 %v453_v54  ;;  %1290 = vmatpush.msrb.mxu1 %v470_v55  ;;  %v518_v54 = vld [vmem:[#allocation2 + $0xc38] sm:$0xff]  ;;  %v535_v55 = vld [vmem:[#allocation2 + $0xcc0] sm:$0xff] }
  0xd0   :  { %1311 = vmatpush.msrb.mxu2 %v485_v56  ;;  %1330 = vmatpush.msrb.mxu3 %v502_v57  ;;  %v550_v56 = vld [vmem:[#allocation2 + $0xd38] sm:$0xff]  ;;  %v567_v57 = vld [vmem:[#allocation2 + $0xdc0] sm:$0xff] }
  0xd1   :  { %1272 = vmatpush.msrb.mxu0 %v452_v58  ;;  %1291 = vmatpush.msrb.mxu1 %v469_v59  ;;  %v517_v58 = vld [vmem:[#allocation2 + $0xc30] sm:$0xff]  ;;  %v534_v59 = vld [vmem:[#allocation2 + $0xcb8] sm:$0xff] }
  0xd2   :  { %1312 = vmatpush.msrb.mxu2 %v484_v60  ;;  %1331 = vmatpush.msrb.mxu3 %v501_v61  ;;  %v549_v60 = vld [vmem:[#allocation2 + $0xd30] sm:$0xff]  ;;  %v566_v61 = vld [vmem:[#allocation2 + $0xdb8] sm:$0xff] }
  0xd3   :  { %1273 = vmatpush.msrb.mxu0 %v451_v62  ;;  %1292 = vmatpush.msrb.mxu1 %v468_v63  ;;  %v516_v62 = vld [vmem:[#allocation2 + $0xc28] sm:$0xff]  ;;  %v533_v63 = vld [vmem:[#allocation2 + $0xcb0] sm:$0xff] }
  0xd4   :  { %1313 = vmatpush.msrb.mxu2 %v483_v0  ;;  %1332 = vmatpush.msrb.mxu3 %v500_v1  ;;  %v548_v0 = vld [vmem:[#allocation2 + $0xd28] sm:$0xff]  ;;  %v565_v1 = vld [vmem:[#allocation2 + $0xdb0] sm:$0xff] }
  0xd5   :  { %1274 = vmatpush.msrb.mxu0 %v450_v2  ;;  %1293 = vmatpush.msrb.mxu1 %v467_v3  ;;  %v515_v2 = vld [vmem:[#allocation2 + $0xc20] sm:$0xff]  ;;  %v532_v3 = vld [vmem:[#allocation2 + $0xca8] sm:$0xff] }
  0xd6   :  { %1314 = vmatpush.msrb.mxu2 %v482_v4  ;;  %1333 = vmatpush.msrb.mxu3 %v499_v5  ;;  %v547_v4 = vld [vmem:[#allocation2 + $0xd20] sm:$0xff]  ;;  %v564_v5 = vld [vmem:[#allocation2 + $0xda8] sm:$0xff] }
  0xd7   :  { %1275 = vmatpush.msrb.mxu0 %v449_v6  ;;  %1294 = vmatpush.msrb.mxu1 %v466_v7  ;;  %v514_v6 = vld [vmem:[#allocation2 + $0xc18] sm:$0xff]  ;;  %v531_v7 = vld [vmem:[#allocation2 + $0xca0] sm:$0xff] }
  0xd8   :  { %1315 = vmatpush.msrb.mxu2 %v481_v8  ;;  %1334 = vmatpush.msrb.mxu3 %v498_v9  ;;  %v546_v8 = vld [vmem:[#allocation2 + $0xd18] sm:$0xff]  ;;  %v563_v9 = vld [vmem:[#allocation2 + $0xda0] sm:$0xff] }
  0xd9   :  { %1276 = vmatpush.msrb.mxu0 %v448_v10  ;;  %1295 = vmatpush.msrb.mxu1 %v465_v11  ;;  %v513_v10 = vld [vmem:[#allocation2 + $0xc10] sm:$0xff]  ;;  %v530_v11 = vld [vmem:[#allocation2 + $0xc98] sm:$0xff] }
  0xda   :  { %1316 = vmatpush.msrb.mxu2 %v480_v12  ;;  %1335 = vmatpush.msrb.mxu3 %v497_v13  ;;  %v545_v12 = vld [vmem:[#allocation2 + $0xd10] sm:$0xff]  ;;  %v562_v13 = vld [vmem:[#allocation2 + $0xd98] sm:$0xff] }
  0xdb   :  { %1277 = vmatpush.msrb.mxu0 %v447_v14  ;;  %1296 = vmatpush.msrb.mxu1 %v464_v15  ;;  %v512_v14 = vld [vmem:[#allocation2 + $0xc08] sm:$0xff]  ;;  %v529_v15 = vld [vmem:[#allocation2 + $0xc90] sm:$0xff] }
  0xdc   :  { %1317 = vmatpush.msrb.mxu2 %v479_v16  ;;  %1336 = vmatpush.msrb.mxu3 %v496_v17  ;;  %v544_v16 = vld [vmem:[#allocation2 + $0xd08] sm:$0xff]  ;;  %v561_v17 = vld [vmem:[#allocation2 + $0xd90] sm:$0xff] }
  0xdd   :  { %1278 = vmatmul.f32.vlgmr.msrb.gmra.mxu0 %v101_v18  ;;  %1318 = vmatmul.f32.vlgmr.msrb.gmra.mxu2 %v103_v19  ;;  %v511_v18 = vld [vmem:[#allocation2 + $0xc00] sm:$0xff]  ;;  %v528_v19 = vld [vmem:[#allocation2 + $0xc88] sm:$0xff] }
  0xde   :  { %1342 = vmatpush.msra.mxu0 %v526_v20  ;;  %1382 = vmatpush.msra.mxu2 %v558_v21  ;;  %v543_v20 = vld [vmem:[#allocation2 + $0xd00] sm:$0xff]  ;;  %v560_v21 = vld [vmem:[#allocation2 + $0xd88] sm:$0xff] }
  0xdf   :  { %1297 = vmatpush.msrb.mxu1 %v463_v22  ;;  %1337 = vmatpush.msrb.mxu3 %v495_v23  ;;  %v105_v22 = vld [vmem:[%s2173_s0 + $0xc0] sm:$0xff]  ;;  %v107_v23 = vld [vmem:[%s2173_s0 + $0xd0] sm:$0xff] }
  0xe0   :  { %1298 = vmatmul.f32.vlgmr.msrb.gmra.mxu1 %v102_v24  ;;  %1338 = vmatmul.f32.vlgmr.msrb.gmra.mxu3 %v104_v25  ;;  %v590_v24 = vld [vmem:[#allocation2 + $0xe78] sm:$0xff] }
  0xe1   :  { %1343 = vmatpush.msra.mxu0 %v525_v26  ;;  %1362 = vmatpush.msra.mxu1 %v542_v27  ;;  %v622_v25 = vld [vmem:[#allocation2 + $0xf78] sm:$0xff]  ;;  %v527_v26 = vld [vmem:[#allocation2 + $0xc80] sm:$0xff] }
  0xe2   :  { %1383 = vmatpush.msra.mxu2 %v557_v28  ;;  %1402 = vmatpush.msra.mxu3 %v574_v29  ;;  %v559_v27 = vld [vmem:[#allocation2 + $0xd80] sm:$0xff]  ;;  %v106_v28 = vld [vmem:[%s2173_s0 + $0xc8] sm:$0xff]  ;;  %v108_v29 = vld [vmem:[%s2173_s0 + $0xd8] sm:$0xff] }
  0xe3   :  { %1344 = vmatpush.msra.mxu0 %v524_v30  ;;  %1363 = vmatpush.msra.mxu1 %v541_v31  ;;  %v589_v30 = vld [vmem:[#allocation2 + $0xe70] sm:$0xff]  ;;  %v606_v31 = vld [vmem:[#allocation2 + $0xef8] sm:$0xff] }
  0xe4   :  { %1384 = vmatpush.msra.mxu2 %v556_v32  ;;  %1403 = vmatpush.msra.mxu3 %v573_v33  ;;  %v621_v32 = vld [vmem:[#allocation2 + $0xf70] sm:$0xff]  ;;  %v638_v33 = vld [vmem:[#allocation2 + $0xff8] sm:$0xff] }
  0xe5   :  { %1345 = vmatpush.msra.mxu0 %v523_v34  ;;  %1364 = vmatpush.msra.mxu1 %v540_v35  ;;  %v588_v34 = vld [vmem:[#allocation2 + $0xe68] sm:$0xff]  ;;  %v605_v35 = vld [vmem:[#allocation2 + $0xef0] sm:$0xff] }
  0xe6   :  { %1385 = vmatpush.msra.mxu2 %v555_v36  ;;  %1404 = vmatpush.msra.mxu3 %v572_v37  ;;  %v620_v36 = vld [vmem:[#allocation2 + $0xf68] sm:$0xff]  ;;  %v637_v37 = vld [vmem:[#allocation2 + $0xff0] sm:$0xff] }
  0xe7   :  { %1346 = vmatpush.msra.mxu0 %v522_v38  ;;  %1365 = vmatpush.msra.mxu1 %v539_v39  ;;  %v587_v38 = vld [vmem:[#allocation2 + $0xe60] sm:$0xff]  ;;  %v604_v39 = vld [vmem:[#allocation2 + $0xee8] sm:$0xff] }
  0xe8   :  { %1386 = vmatpush.msra.mxu2 %v554_v40  ;;  %1405 = vmatpush.msra.mxu3 %v571_v41  ;;  %v619_v40 = vld [vmem:[#allocation2 + $0xf60] sm:$0xff]  ;;  %v636_v41 = vld [vmem:[#allocation2 + $0xfe8] sm:$0xff] }
  0xe9   :  { %1347 = vmatpush.msra.mxu0 %v521_v42  ;;  %1366 = vmatpush.msra.mxu1 %v538_v43  ;;  %v586_v42 = vld [vmem:[#allocation2 + $0xe58] sm:$0xff]  ;;  %v603_v43 = vld [vmem:[#allocation2 + $0xee0] sm:$0xff] }
  0xea   :  { %1387 = vmatpush.msra.mxu2 %v553_v44  ;;  %1406 = vmatpush.msra.mxu3 %v570_v45  ;;  %v618_v44 = vld [vmem:[#allocation2 + $0xf58] sm:$0xff]  ;;  %v635_v45 = vld [vmem:[#allocation2 + $0xfe0] sm:$0xff] }
  0xeb   :  { %1348 = vmatpush.msra.mxu0 %v520_v46  ;;  %1367 = vmatpush.msra.mxu1 %v537_v47  ;;  %v585_v46 = vld [vmem:[#allocation2 + $0xe50] sm:$0xff]  ;;  %v602_v47 = vld [vmem:[#allocation2 + $0xed8] sm:$0xff] }
  0xec   :  { %1388 = vmatpush.msra.mxu2 %v552_v48  ;;  %1407 = vmatpush.msra.mxu3 %v569_v49  ;;  %v617_v48 = vld [vmem:[#allocation2 + $0xf50] sm:$0xff]  ;;  %v634_v49 = vld [vmem:[#allocation2 + $0xfd8] sm:$0xff] }
  0xed   :  { %1349 = vmatpush.msra.mxu0 %v519_v50  ;;  %1368 = vmatpush.msra.mxu1 %v536_v51  ;;  %v584_v50 = vld [vmem:[#allocation2 + $0xe48] sm:$0xff]  ;;  %v601_v51 = vld [vmem:[#allocation2 + $0xed0] sm:$0xff] }
  0xee   :  { %1389 = vmatpush.msra.mxu2 %v551_v52  ;;  %1408 = vmatpush.msra.mxu3 %v568_v53  ;;  %v616_v52 = vld [vmem:[#allocation2 + $0xf48] sm:$0xff]  ;;  %v633_v53 = vld [vmem:[#allocation2 + $0xfd0] sm:$0xff] }
  0xef   :  { %1350 = vmatpush.msra.mxu0 %v518_v54  ;;  %1369 = vmatpush.msra.mxu1 %v535_v55  ;;  %v583_v54 = vld [vmem:[#allocation2 + $0xe40] sm:$0xff]  ;;  %v600_v55 = vld [vmem:[#allocation2 + $0xec8] sm:$0xff] }
  0xf0   :  { %1390 = vmatpush.msra.mxu2 %v550_v56  ;;  %1409 = vmatpush.msra.mxu3 %v567_v57  ;;  %v615_v56 = vld [vmem:[#allocation2 + $0xf40] sm:$0xff]  ;;  %v632_v57 = vld [vmem:[#allocation2 + $0xfc8] sm:$0xff] }
  0xf1   :  { %1351 = vmatpush.msra.mxu0 %v517_v58  ;;  %1370 = vmatpush.msra.mxu1 %v534_v59  ;;  %v582_v58 = vld [vmem:[#allocation2 + $0xe38] sm:$0xff]  ;;  %v599_v59 = vld [vmem:[#allocation2 + $0xec0] sm:$0xff] }
  0xf2   :  { %1391 = vmatpush.msra.mxu2 %v549_v60  ;;  %1410 = vmatpush.msra.mxu3 %v566_v61  ;;  %v614_v60 = vld [vmem:[#allocation2 + $0xf38] sm:$0xff]  ;;  %v631_v61 = vld [vmem:[#allocation2 + $0xfc0] sm:$0xff] }
  0xf3   :  { %1352 = vmatpush.msra.mxu0 %v516_v62  ;;  %1371 = vmatpush.msra.mxu1 %v533_v63  ;;  %v581_v62 = vld [vmem:[#allocation2 + $0xe30] sm:$0xff]  ;;  %v598_v63 = vld [vmem:[#allocation2 + $0xeb8] sm:$0xff] }
  0xf4   :  { %1392 = vmatpush.msra.mxu2 %v548_v0  ;;  %1411 = vmatpush.msra.mxu3 %v565_v1  ;;  %v613_v0 = vld [vmem:[#allocation2 + $0xf30] sm:$0xff]  ;;  %v630_v1 = vld [vmem:[#allocation2 + $0xfb8] sm:$0xff] }
  0xf5   :  { %1353 = vmatpush.msra.mxu0 %v515_v2  ;;  %1372 = vmatpush.msra.mxu1 %v532_v3  ;;  %v580_v2 = vld [vmem:[#allocation2 + $0xe28] sm:$0xff]  ;;  %v597_v3 = vld [vmem:[#allocation2 + $0xeb0] sm:$0xff] }
  0xf6   :  { %1393 = vmatpush.msra.mxu2 %v547_v4  ;;  %1412 = vmatpush.msra.mxu3 %v564_v5  ;;  %v612_v4 = vld [vmem:[#allocation2 + $0xf28] sm:$0xff]  ;;  %v629_v5 = vld [vmem:[#allocation2 + $0xfb0] sm:$0xff] }
  0xf7   :  { %1354 = vmatpush.msra.mxu0 %v514_v6  ;;  %1373 = vmatpush.msra.mxu1 %v531_v7  ;;  %v579_v6 = vld [vmem:[#allocation2 + $0xe20] sm:$0xff]  ;;  %v596_v7 = vld [vmem:[#allocation2 + $0xea8] sm:$0xff] }
  0xf8   :  { %1394 = vmatpush.msra.mxu2 %v546_v8  ;;  %1413 = vmatpush.msra.mxu3 %v563_v9  ;;  %v611_v8 = vld [vmem:[#allocation2 + $0xf20] sm:$0xff]  ;;  %v628_v9 = vld [vmem:[#allocation2 + $0xfa8] sm:$0xff] }
  0xf9   :  { %1355 = vmatpush.msra.mxu0 %v513_v10  ;;  %1374 = vmatpush.msra.mxu1 %v530_v11  ;;  %v578_v10 = vld [vmem:[#allocation2 + $0xe18] sm:$0xff]  ;;  %v595_v11 = vld [vmem:[#allocation2 + $0xea0] sm:$0xff] }
  0xfa   :  { %1395 = vmatpush.msra.mxu2 %v545_v12  ;;  %1414 = vmatpush.msra.mxu3 %v562_v13  ;;  %v610_v12 = vld [vmem:[#allocation2 + $0xf18] sm:$0xff]  ;;  %v627_v13 = vld [vmem:[#allocation2 + $0xfa0] sm:$0xff] }
  0xfb   :  { %1356 = vmatpush.msra.mxu0 %v512_v14  ;;  %1375 = vmatpush.msra.mxu1 %v529_v15  ;;  %v577_v14 = vld [vmem:[#allocation2 + $0xe10] sm:$0xff]  ;;  %v594_v15 = vld [vmem:[#allocation2 + $0xe98] sm:$0xff] }
  0xfc   :  { %1396 = vmatpush.msra.mxu2 %v544_v16  ;;  %1415 = vmatpush.msra.mxu3 %v561_v17  ;;  %v609_v16 = vld [vmem:[#allocation2 + $0xf10] sm:$0xff]  ;;  %v626_v17 = vld [vmem:[#allocation2 + $0xf98] sm:$0xff] }
  0xfd   :  { %1357 = vmatpush.msra.mxu0 %v511_v18  ;;  %1376 = vmatpush.msra.mxu1 %v528_v19  ;;  %v576_v18 = vld [vmem:[#allocation2 + $0xe08] sm:$0xff]  ;;  %v593_v19 = vld [vmem:[#allocation2 + $0xe90] sm:$0xff] }
  0xfe   :  { %1397 = vmatpush.msra.mxu2 %v543_v20  ;;  %1416 = vmatpush.msra.mxu3 %v560_v21  ;;  %v608_v20 = vld [vmem:[#allocation2 + $0xf08] sm:$0xff]  ;;  %v625_v21 = vld [vmem:[#allocation2 + $0xf90] sm:$0xff] }
  0xff   :  { %1358 = vmatmul.f32.vlgmr.msra.gmra.mxu0 %v105_v22  ;;  %1398 = vmatmul.f32.vlgmr.msra.gmra.mxu2 %v107_v23  ;;  %v575_v22 = vld [vmem:[#allocation2 + $0xe00] sm:$0xff]  ;;  %v592_v23 = vld [vmem:[#allocation2 + $0xe88] sm:$0xff] }
 0x100   :  { %1422 = vmatpush.msrb.mxu0 %v590_v24  ;;  %1462 = vmatpush.msrb.mxu2 %v622_v25  ;;  %v607_v24 = vld [vmem:[#allocation2 + $0xf00] sm:$0xff]  ;;  %v624_v25 = vld [vmem:[#allocation2 + $0xf88] sm:$0xff] }
 0x101   :  { %1377 = vmatpush.msra.mxu1 %v527_v26  ;;  %1417 = vmatpush.msra.mxu3 %v559_v27  ;;  %v109_v26 = vld [vmem:[%s2173_s0 + $0xe0] sm:$0xff]  ;;  %v111_v27 = vld [vmem:[%s2173_s0 + $0xf0] sm:$0xff] }
 0x102   :  { %1378 = vmatmul.f32.vlgmr.msra.gmra.mxu1 %v106_v28  ;;  %1418 = vmatmul.f32.vlgmr.msra.gmra.mxu3 %v108_v29  ;;  %v654_v28 = vld [vmem:[#allocation2 + $0x1078] sm:$0xff] }
 0x103   :  { %1423 = vmatpush.msrb.mxu0 %v589_v30  ;;  %1442 = vmatpush.msrb.mxu1 %v606_v31  ;;  %v686_v29 = vld [vmem:[#allocation2 + $0x1178] sm:$0xff]  ;;  %v591_v30 = vld [vmem:[#allocation2 + $0xe80] sm:$0xff] }
 0x104   :  { %1463 = vmatpush.msrb.mxu2 %v621_v32  ;;  %1482 = vmatpush.msrb.mxu3 %v638_v33  ;;  %v623_v31 = vld [vmem:[#allocation2 + $0xf80] sm:$0xff]  ;;  %v110_v32 = vld [vmem:[%s2173_s0 + $0xe8] sm:$0xff]  ;;  %v112_v33 = vld [vmem:[%s2173_s0 + $0xf8] sm:$0xff] }
 0x105   :  { %1424 = vmatpush.msrb.mxu0 %v588_v34  ;;  %1443 = vmatpush.msrb.mxu1 %v605_v35  ;;  %v653_v34 = vld [vmem:[#allocation2 + $0x1070] sm:$0xff]  ;;  %v670_v35 = vld [vmem:[#allocation2 + $0x10f8] sm:$0xff] }
 0x106   :  { %1464 = vmatpush.msrb.mxu2 %v620_v36  ;;  %1483 = vmatpush.msrb.mxu3 %v637_v37  ;;  %v685_v36 = vld [vmem:[#allocation2 + $0x1170] sm:$0xff]  ;;  %v702_v37 = vld [vmem:[#allocation2 + $0x11f8] sm:$0xff] }
 0x107   :  { %1425 = vmatpush.msrb.mxu0 %v587_v38  ;;  %1444 = vmatpush.msrb.mxu1 %v604_v39  ;;  %v652_v38 = vld [vmem:[#allocation2 + $0x1068] sm:$0xff]  ;;  %v669_v39 = vld [vmem:[#allocation2 + $0x10f0] sm:$0xff] }
 0x108   :  { %1465 = vmatpush.msrb.mxu2 %v619_v40  ;;  %1484 = vmatpush.msrb.mxu3 %v636_v41  ;;  %v684_v40 = vld [vmem:[#allocation2 + $0x1168] sm:$0xff]  ;;  %v701_v41 = vld [vmem:[#allocation2 + $0x11f0] sm:$0xff] }
 0x109   :  { %1426 = vmatpush.msrb.mxu0 %v586_v42  ;;  %1445 = vmatpush.msrb.mxu1 %v603_v43  ;;  %v651_v42 = vld [vmem:[#allocation2 + $0x1060] sm:$0xff]  ;;  %v668_v43 = vld [vmem:[#allocation2 + $0x10e8] sm:$0xff] }
 0x10a   :  { %1466 = vmatpush.msrb.mxu2 %v618_v44  ;;  %1485 = vmatpush.msrb.mxu3 %v635_v45  ;;  %v683_v44 = vld [vmem:[#allocation2 + $0x1160] sm:$0xff]  ;;  %v700_v45 = vld [vmem:[#allocation2 + $0x11e8] sm:$0xff] }
 0x10b   :  { %1427 = vmatpush.msrb.mxu0 %v585_v46  ;;  %1446 = vmatpush.msrb.mxu1 %v602_v47  ;;  %v650_v46 = vld [vmem:[#allocation2 + $0x1058] sm:$0xff]  ;;  %v667_v47 = vld [vmem:[#allocation2 + $0x10e0] sm:$0xff] }
 0x10c   :  { %1467 = vmatpush.msrb.mxu2 %v617_v48  ;;  %1486 = vmatpush.msrb.mxu3 %v634_v49  ;;  %v682_v48 = vld [vmem:[#allocation2 + $0x1158] sm:$0xff]  ;;  %v699_v49 = vld [vmem:[#allocation2 + $0x11e0] sm:$0xff] }
 0x10d   :  { %1428 = vmatpush.msrb.mxu0 %v584_v50  ;;  %1447 = vmatpush.msrb.mxu1 %v601_v51  ;;  %v649_v50 = vld [vmem:[#allocation2 + $0x1050] sm:$0xff]  ;;  %v666_v51 = vld [vmem:[#allocation2 + $0x10d8] sm:$0xff] }
 0x10e   :  { %1468 = vmatpush.msrb.mxu2 %v616_v52  ;;  %1487 = vmatpush.msrb.mxu3 %v633_v53  ;;  %v681_v52 = vld [vmem:[#allocation2 + $0x1150] sm:$0xff]  ;;  %v698_v53 = vld [vmem:[#allocation2 + $0x11d8] sm:$0xff] }
 0x10f   :  { %1429 = vmatpush.msrb.mxu0 %v583_v54  ;;  %1448 = vmatpush.msrb.mxu1 %v600_v55  ;;  %v648_v54 = vld [vmem:[#allocation2 + $0x1048] sm:$0xff]  ;;  %v665_v55 = vld [vmem:[#allocation2 + $0x10d0] sm:$0xff] }
 0x110   :  { %1469 = vmatpush.msrb.mxu2 %v615_v56  ;;  %1488 = vmatpush.msrb.mxu3 %v632_v57  ;;  %v680_v56 = vld [vmem:[#allocation2 + $0x1148] sm:$0xff]  ;;  %v697_v57 = vld [vmem:[#allocation2 + $0x11d0] sm:$0xff] }
 0x111   :  { %1430 = vmatpush.msrb.mxu0 %v582_v58  ;;  %1449 = vmatpush.msrb.mxu1 %v599_v59  ;;  %v647_v58 = vld [vmem:[#allocation2 + $0x1040] sm:$0xff]  ;;  %v664_v59 = vld [vmem:[#allocation2 + $0x10c8] sm:$0xff] }
 0x112   :  { %1470 = vmatpush.msrb.mxu2 %v614_v60  ;;  %1489 = vmatpush.msrb.mxu3 %v631_v61  ;;  %v679_v60 = vld [vmem:[#allocation2 + $0x1140] sm:$0xff]  ;;  %v696_v61 = vld [vmem:[#allocation2 + $0x11c8] sm:$0xff] }
 0x113   :  { %1431 = vmatpush.msrb.mxu0 %v581_v62  ;;  %1450 = vmatpush.msrb.mxu1 %v598_v63  ;;  %v646_v62 = vld [vmem:[#allocation2 + $0x1038] sm:$0xff]  ;;  %v663_v63 = vld [vmem:[#allocation2 + $0x10c0] sm:$0xff] }
 0x114   :  { %1471 = vmatpush.msrb.mxu2 %v613_v0  ;;  %1490 = vmatpush.msrb.mxu3 %v630_v1  ;;  %v678_v0 = vld [vmem:[#allocation2 + $0x1138] sm:$0xff]  ;;  %v695_v1 = vld [vmem:[#allocation2 + $0x11c0] sm:$0xff] }
 0x115   :  { %1432 = vmatpush.msrb.mxu0 %v580_v2  ;;  %1451 = vmatpush.msrb.mxu1 %v597_v3  ;;  %v645_v2 = vld [vmem:[#allocation2 + $0x1030] sm:$0xff]  ;;  %v662_v3 = vld [vmem:[#allocation2 + $0x10b8] sm:$0xff] }
 0x116   :  { %1472 = vmatpush.msrb.mxu2 %v612_v4  ;;  %1491 = vmatpush.msrb.mxu3 %v629_v5  ;;  %v677_v4 = vld [vmem:[#allocation2 + $0x1130] sm:$0xff]  ;;  %v694_v5 = vld [vmem:[#allocation2 + $0x11b8] sm:$0xff] }
 0x117   :  { %1433 = vmatpush.msrb.mxu0 %v579_v6  ;;  %1452 = vmatpush.msrb.mxu1 %v596_v7  ;;  %v644_v6 = vld [vmem:[#allocation2 + $0x1028] sm:$0xff]  ;;  %v661_v7 = vld [vmem:[#allocation2 + $0x10b0] sm:$0xff] }
 0x118   :  { %1473 = vmatpush.msrb.mxu2 %v611_v8  ;;  %1492 = vmatpush.msrb.mxu3 %v628_v9  ;;  %v676_v8 = vld [vmem:[#allocation2 + $0x1128] sm:$0xff]  ;;  %v693_v9 = vld [vmem:[#allocation2 + $0x11b0] sm:$0xff] }
 0x119   :  { %1434 = vmatpush.msrb.mxu0 %v578_v10  ;;  %1453 = vmatpush.msrb.mxu1 %v595_v11  ;;  %v643_v10 = vld [vmem:[#allocation2 + $0x1020] sm:$0xff]  ;;  %v660_v11 = vld [vmem:[#allocation2 + $0x10a8] sm:$0xff] }
 0x11a   :  { %1474 = vmatpush.msrb.mxu2 %v610_v12  ;;  %1493 = vmatpush.msrb.mxu3 %v627_v13  ;;  %v675_v12 = vld [vmem:[#allocation2 + $0x1120] sm:$0xff]  ;;  %v692_v13 = vld [vmem:[#allocation2 + $0x11a8] sm:$0xff] }
 0x11b   :  { %1435 = vmatpush.msrb.mxu0 %v577_v14  ;;  %1454 = vmatpush.msrb.mxu1 %v594_v15  ;;  %v642_v14 = vld [vmem:[#allocation2 + $0x1018] sm:$0xff]  ;;  %v659_v15 = vld [vmem:[#allocation2 + $0x10a0] sm:$0xff] }
 0x11c   :  { %1475 = vmatpush.msrb.mxu2 %v609_v16  ;;  %1494 = vmatpush.msrb.mxu3 %v626_v17  ;;  %v674_v16 = vld [vmem:[#allocation2 + $0x1118] sm:$0xff]  ;;  %v691_v17 = vld [vmem:[#allocation2 + $0x11a0] sm:$0xff] }
 0x11d   :  { %1436 = vmatpush.msrb.mxu0 %v576_v18  ;;  %1455 = vmatpush.msrb.mxu1 %v593_v19  ;;  %v641_v18 = vld [vmem:[#allocation2 + $0x1010] sm:$0xff]  ;;  %v658_v19 = vld [vmem:[#allocation2 + $0x1098] sm:$0xff] }
 0x11e   :  { %1476 = vmatpush.msrb.mxu2 %v608_v20  ;;  %1495 = vmatpush.msrb.mxu3 %v625_v21  ;;  %v673_v20 = vld [vmem:[#allocation2 + $0x1110] sm:$0xff]  ;;  %v690_v21 = vld [vmem:[#allocation2 + $0x1198] sm:$0xff] }
 0x11f   :  { %1437 = vmatpush.msrb.mxu0 %v575_v22  ;;  %1456 = vmatpush.msrb.mxu1 %v592_v23  ;;  %v640_v22 = vld [vmem:[#allocation2 + $0x1008] sm:$0xff]  ;;  %v657_v23 = vld [vmem:[#allocation2 + $0x1090] sm:$0xff] }
 0x120   :  { %1477 = vmatpush.msrb.mxu2 %v607_v24  ;;  %1496 = vmatpush.msrb.mxu3 %v624_v25  ;;  %v672_v24 = vld [vmem:[#allocation2 + $0x1108] sm:$0xff]  ;;  %v689_v25 = vld [vmem:[#allocation2 + $0x1190] sm:$0xff] }
 0x121   :  { %1438 = vmatmul.f32.vlgmr.msrb.gmra.mxu0 %v109_v26  ;;  %1478 = vmatmul.f32.vlgmr.msrb.gmra.mxu2 %v111_v27  ;;  %v639_v26 = vld [vmem:[#allocation2 + $0x1000] sm:$0xff]  ;;  %v656_v27 = vld [vmem:[#allocation2 + $0x1088] sm:$0xff] }
 0x122   :  { %1502 = vmatpush.msra.mxu0 %v654_v28  ;;  %1542 = vmatpush.msra.mxu2 %v686_v29  ;;  %v671_v28 = vld [vmem:[#allocation2 + $0x1100] sm:$0xff]  ;;  %v688_v29 = vld [vmem:[#allocation2 + $0x1188] sm:$0xff] }
 0x123   :  { %1457 = vmatpush.msrb.mxu1 %v591_v30  ;;  %1497 = vmatpush.msrb.mxu3 %v623_v31  ;;  %v113_v30 = vld [vmem:[%s2173_s0 + $0x100] sm:$0xff]  ;;  %v115_v31 = vld [vmem:[%s2173_s0 + $0x110] sm:$0xff] }
 0x124   :  { %1458 = vmatmul.f32.vlgmr.msrb.gmra.mxu1 %v110_v32  ;;  %1498 = vmatmul.f32.vlgmr.msrb.gmra.mxu3 %v112_v33  ;;  %v718_v32 = vld [vmem:[#allocation2 + $0x1278] sm:$0xff] }
 0x125   :  { %1503 = vmatpush.msra.mxu0 %v653_v34  ;;  %1522 = vmatpush.msra.mxu1 %v670_v35  ;;  %v750_v33 = vld [vmem:[#allocation2 + $0x1378] sm:$0xff]  ;;  %v655_v34 = vld [vmem:[#allocation2 + $0x1080] sm:$0xff] }
 0x126   :  { %1543 = vmatpush.msra.mxu2 %v685_v36  ;;  %1562 = vmatpush.msra.mxu3 %v702_v37  ;;  %v687_v35 = vld [vmem:[#allocation2 + $0x1180] sm:$0xff]  ;;  %v114_v36 = vld [vmem:[%s2173_s0 + $0x108] sm:$0xff]  ;;  %v116_v37 = vld [vmem:[%s2173_s0 + $0x118] sm:$0xff] }
 0x127   :  { %1504 = vmatpush.msra.mxu0 %v652_v38  ;;  %1523 = vmatpush.msra.mxu1 %v669_v39  ;;  %v717_v38 = vld [vmem:[#allocation2 + $0x1270] sm:$0xff]  ;;  %v734_v39 = vld [vmem:[#allocation2 + $0x12f8] sm:$0xff] }
 0x128   :  { %1544 = vmatpush.msra.mxu2 %v684_v40  ;;  %1563 = vmatpush.msra.mxu3 %v701_v41  ;;  %v749_v40 = vld [vmem:[#allocation2 + $0x1370] sm:$0xff]  ;;  %v766_v41 = vld [vmem:[#allocation2 + $0x13f8] sm:$0xff] }
 0x129   :  { %1505 = vmatpush.msra.mxu0 %v651_v42  ;;  %1524 = vmatpush.msra.mxu1 %v668_v43  ;;  %v716_v42 = vld [vmem:[#allocation2 + $0x1268] sm:$0xff]  ;;  %v733_v43 = vld [vmem:[#allocation2 + $0x12f0] sm:$0xff] }
 0x12a   :  { %1545 = vmatpush.msra.mxu2 %v683_v44  ;;  %1564 = vmatpush.msra.mxu3 %v700_v45  ;;  %v748_v44 = vld [vmem:[#allocation2 + $0x1368] sm:$0xff]  ;;  %v765_v45 = vld [vmem:[#allocation2 + $0x13f0] sm:$0xff] }
 0x12b   :  { %1506 = vmatpush.msra.mxu0 %v650_v46  ;;  %1525 = vmatpush.msra.mxu1 %v667_v47  ;;  %v715_v46 = vld [vmem:[#allocation2 + $0x1260] sm:$0xff]  ;;  %v732_v47 = vld [vmem:[#allocation2 + $0x12e8] sm:$0xff] }
 0x12c   :  { %1546 = vmatpush.msra.mxu2 %v682_v48  ;;  %1565 = vmatpush.msra.mxu3 %v699_v49  ;;  %v747_v48 = vld [vmem:[#allocation2 + $0x1360] sm:$0xff]  ;;  %v764_v49 = vld [vmem:[#allocation2 + $0x13e8] sm:$0xff] }
 0x12d   :  { %1507 = vmatpush.msra.mxu0 %v649_v50  ;;  %1526 = vmatpush.msra.mxu1 %v666_v51  ;;  %v714_v50 = vld [vmem:[#allocation2 + $0x1258] sm:$0xff]  ;;  %v731_v51 = vld [vmem:[#allocation2 + $0x12e0] sm:$0xff] }
 0x12e   :  { %1547 = vmatpush.msra.mxu2 %v681_v52  ;;  %1566 = vmatpush.msra.mxu3 %v698_v53  ;;  %v746_v52 = vld [vmem:[#allocation2 + $0x1358] sm:$0xff]  ;;  %v763_v53 = vld [vmem:[#allocation2 + $0x13e0] sm:$0xff] }
 0x12f   :  { %1508 = vmatpush.msra.mxu0 %v648_v54  ;;  %1527 = vmatpush.msra.mxu1 %v665_v55  ;;  %v713_v54 = vld [vmem:[#allocation2 + $0x1250] sm:$0xff]  ;;  %v730_v55 = vld [vmem:[#allocation2 + $0x12d8] sm:$0xff] }
 0x130   :  { %1548 = vmatpush.msra.mxu2 %v680_v56  ;;  %1567 = vmatpush.msra.mxu3 %v697_v57  ;;  %v745_v56 = vld [vmem:[#allocation2 + $0x1350] sm:$0xff]  ;;  %v762_v57 = vld [vmem:[#allocation2 + $0x13d8] sm:$0xff] }
 0x131   :  { %1509 = vmatpush.msra.mxu0 %v647_v58  ;;  %1528 = vmatpush.msra.mxu1 %v664_v59  ;;  %v712_v58 = vld [vmem:[#allocation2 + $0x1248] sm:$0xff]  ;;  %v729_v59 = vld [vmem:[#allocation2 + $0x12d0] sm:$0xff] }
 0x132   :  { %1549 = vmatpush.msra.mxu2 %v679_v60  ;;  %1568 = vmatpush.msra.mxu3 %v696_v61  ;;  %v744_v60 = vld [vmem:[#allocation2 + $0x1348] sm:$0xff]  ;;  %v761_v61 = vld [vmem:[#allocation2 + $0x13d0] sm:$0xff] }
 0x133   :  { %1510 = vmatpush.msra.mxu0 %v646_v62  ;;  %1529 = vmatpush.msra.mxu1 %v663_v63  ;;  %v711_v62 = vld [vmem:[#allocation2 + $0x1240] sm:$0xff]  ;;  %v728_v63 = vld [vmem:[#allocation2 + $0x12c8] sm:$0xff] }
 0x134   :  { %1550 = vmatpush.msra.mxu2 %v678_v0  ;;  %1569 = vmatpush.msra.mxu3 %v695_v1  ;;  %v743_v0 = vld [vmem:[#allocation2 + $0x1340] sm:$0xff]  ;;  %v760_v1 = vld [vmem:[#allocation2 + $0x13c8] sm:$0xff] }
 0x135   :  { %1511 = vmatpush.msra.mxu0 %v645_v2  ;;  %1530 = vmatpush.msra.mxu1 %v662_v3  ;;  %v710_v2 = vld [vmem:[#allocation2 + $0x1238] sm:$0xff]  ;;  %v727_v3 = vld [vmem:[#allocation2 + $0x12c0] sm:$0xff] }
 0x136   :  { %1551 = vmatpush.msra.mxu2 %v677_v4  ;;  %1570 = vmatpush.msra.mxu3 %v694_v5  ;;  %v742_v4 = vld [vmem:[#allocation2 + $0x1338] sm:$0xff]  ;;  %v759_v5 = vld [vmem:[#allocation2 + $0x13c0] sm:$0xff] }
 0x137   :  { %1512 = vmatpush.msra.mxu0 %v644_v6  ;;  %1531 = vmatpush.msra.mxu1 %v661_v7  ;;  %v709_v6 = vld [vmem:[#allocation2 + $0x1230] sm:$0xff]  ;;  %v726_v7 = vld [vmem:[#allocation2 + $0x12b8] sm:$0xff] }
 0x138   :  { %1552 = vmatpush.msra.mxu2 %v676_v8  ;;  %1571 = vmatpush.msra.mxu3 %v693_v9  ;;  %v741_v8 = vld [vmem:[#allocation2 + $0x1330] sm:$0xff]  ;;  %v758_v9 = vld [vmem:[#allocation2 + $0x13b8] sm:$0xff] }
 0x139   :  { %1513 = vmatpush.msra.mxu0 %v643_v10  ;;  %1532 = vmatpush.msra.mxu1 %v660_v11  ;;  %v708_v10 = vld [vmem:[#allocation2 + $0x1228] sm:$0xff]  ;;  %v725_v11 = vld [vmem:[#allocation2 + $0x12b0] sm:$0xff] }
 0x13a   :  { %1553 = vmatpush.msra.mxu2 %v675_v12  ;;  %1572 = vmatpush.msra.mxu3 %v692_v13  ;;  %v740_v12 = vld [vmem:[#allocation2 + $0x1328] sm:$0xff]  ;;  %v757_v13 = vld [vmem:[#allocation2 + $0x13b0] sm:$0xff] }
 0x13b   :  { %1514 = vmatpush.msra.mxu0 %v642_v14  ;;  %1533 = vmatpush.msra.mxu1 %v659_v15  ;;  %v707_v14 = vld [vmem:[#allocation2 + $0x1220] sm:$0xff]  ;;  %v724_v15 = vld [vmem:[#allocation2 + $0x12a8] sm:$0xff] }
 0x13c   :  { %1554 = vmatpush.msra.mxu2 %v674_v16  ;;  %1573 = vmatpush.msra.mxu3 %v691_v17  ;;  %v739_v16 = vld [vmem:[#allocation2 + $0x1320] sm:$0xff]  ;;  %v756_v17 = vld [vmem:[#allocation2 + $0x13a8] sm:$0xff] }
 0x13d   :  { %1515 = vmatpush.msra.mxu0 %v641_v18  ;;  %1534 = vmatpush.msra.mxu1 %v658_v19  ;;  %v706_v18 = vld [vmem:[#allocation2 + $0x1218] sm:$0xff]  ;;  %v723_v19 = vld [vmem:[#allocation2 + $0x12a0] sm:$0xff] }
 0x13e   :  { %1555 = vmatpush.msra.mxu2 %v673_v20  ;;  %1574 = vmatpush.msra.mxu3 %v690_v21  ;;  %v738_v20 = vld [vmem:[#allocation2 + $0x1318] sm:$0xff]  ;;  %v755_v21 = vld [vmem:[#allocation2 + $0x13a0] sm:$0xff] }
 0x13f   :  { %1516 = vmatpush.msra.mxu0 %v640_v22  ;;  %1535 = vmatpush.msra.mxu1 %v657_v23  ;;  %v705_v22 = vld [vmem:[#allocation2 + $0x1210] sm:$0xff]  ;;  %v722_v23 = vld [vmem:[#allocation2 + $0x1298] sm:$0xff] }
 0x140   :  { %1556 = vmatpush.msra.mxu2 %v672_v24  ;;  %1575 = vmatpush.msra.mxu3 %v689_v25  ;;  %v737_v24 = vld [vmem:[#allocation2 + $0x1310] sm:$0xff]  ;;  %v754_v25 = vld [vmem:[#allocation2 + $0x1398] sm:$0xff] }
 0x141   :  { %1517 = vmatpush.msra.mxu0 %v639_v26  ;;  %1536 = vmatpush.msra.mxu1 %v656_v27  ;;  %v704_v26 = vld [vmem:[#allocation2 + $0x1208] sm:$0xff]  ;;  %v721_v27 = vld [vmem:[#allocation2 + $0x1290] sm:$0xff] }
 0x142   :  { %1557 = vmatpush.msra.mxu2 %v671_v28  ;;  %1576 = vmatpush.msra.mxu3 %v688_v29  ;;  %v736_v28 = vld [vmem:[#allocation2 + $0x1308] sm:$0xff]  ;;  %v753_v29 = vld [vmem:[#allocation2 + $0x1390] sm:$0xff] }
 0x143   :  { %1518 = vmatmul.f32.vlgmr.msra.gmra.mxu0 %v113_v30  ;;  %1558 = vmatmul.f32.vlgmr.msra.gmra.mxu2 %v115_v31  ;;  %v703_v30 = vld [vmem:[#allocation2 + $0x1200] sm:$0xff]  ;;  %v720_v31 = vld [vmem:[#allocation2 + $0x1288] sm:$0xff] }
 0x144   :  { %1582 = vmatpush.msrb.mxu0 %v718_v32  ;;  %1622 = vmatpush.msrb.mxu2 %v750_v33  ;;  %v735_v32 = vld [vmem:[#allocation2 + $0x1300] sm:$0xff]  ;;  %v752_v33 = vld [vmem:[#allocation2 + $0x1388] sm:$0xff] }
 0x145   :  { %1537 = vmatpush.msra.mxu1 %v655_v34  ;;  %1577 = vmatpush.msra.mxu3 %v687_v35  ;;  %v117_v34 = vld [vmem:[%s2173_s0 + $0x120] sm:$0xff]  ;;  %v119_v35 = vld [vmem:[%s2173_s0 + $0x130] sm:$0xff] }
 0x146   :  { %1538 = vmatmul.f32.vlgmr.msra.gmra.mxu1 %v114_v36  ;;  %1578 = vmatmul.f32.vlgmr.msra.gmra.mxu3 %v116_v37  ;;  %v782_v36 = vld [vmem:[#allocation2 + $0x1478] sm:$0xff] }
 0x147   :  { %1583 = vmatpush.msrb.mxu0 %v717_v38  ;;  %1602 = vmatpush.msrb.mxu1 %v734_v39  ;;  %v814_v37 = vld [vmem:[#allocation2 + $0x1578] sm:$0xff]  ;;  %v719_v38 = vld [vmem:[#allocation2 + $0x1280] sm:$0xff] }
 0x148   :  { %1623 = vmatpush.msrb.mxu2 %v749_v40  ;;  %1642 = vmatpush.msrb.mxu3 %v766_v41  ;;  %v751_v39 = vld [vmem:[#allocation2 + $0x1380] sm:$0xff]  ;;  %v118_v40 = vld [vmem:[%s2173_s0 + $0x128] sm:$0xff]  ;;  %v120_v41 = vld [vmem:[%s2173_s0 + $0x138] sm:$0xff] }
 0x149   :  { %1584 = vmatpush.msrb.mxu0 %v716_v42  ;;  %1603 = vmatpush.msrb.mxu1 %v733_v43  ;;  %v781_v42 = vld [vmem:[#allocation2 + $0x1470] sm:$0xff]  ;;  %v798_v43 = vld [vmem:[#allocation2 + $0x14f8] sm:$0xff] }
 0x14a   :  { %1624 = vmatpush.msrb.mxu2 %v748_v44  ;;  %1643 = vmatpush.msrb.mxu3 %v765_v45  ;;  %v813_v44 = vld [vmem:[#allocation2 + $0x1570] sm:$0xff]  ;;  %v830_v45 = vld [vmem:[#allocation2 + $0x15f8] sm:$0xff] }
 0x14b   :  { %1585 = vmatpush.msrb.mxu0 %v715_v46  ;;  %1604 = vmatpush.msrb.mxu1 %v732_v47  ;;  %v780_v46 = vld [vmem:[#allocation2 + $0x1468] sm:$0xff]  ;;  %v797_v47 = vld [vmem:[#allocation2 + $0x14f0] sm:$0xff] }
 0x14c   :  { %1625 = vmatpush.msrb.mxu2 %v747_v48  ;;  %1644 = vmatpush.msrb.mxu3 %v764_v49  ;;  %v812_v48 = vld [vmem:[#allocation2 + $0x1568] sm:$0xff]  ;;  %v829_v49 = vld [vmem:[#allocation2 + $0x15f0] sm:$0xff] }
 0x14d   :  { %1586 = vmatpush.msrb.mxu0 %v714_v50  ;;  %1605 = vmatpush.msrb.mxu1 %v731_v51  ;;  %v779_v50 = vld [vmem:[#allocation2 + $0x1460] sm:$0xff]  ;;  %v796_v51 = vld [vmem:[#allocation2 + $0x14e8] sm:$0xff] }
 0x14e   :  { %1626 = vmatpush.msrb.mxu2 %v746_v52  ;;  %1645 = vmatpush.msrb.mxu3 %v763_v53  ;;  %v811_v52 = vld [vmem:[#allocation2 + $0x1560] sm:$0xff]  ;;  %v828_v53 = vld [vmem:[#allocation2 + $0x15e8] sm:$0xff] }
 0x14f   :  { %1587 = vmatpush.msrb.mxu0 %v713_v54  ;;  %1606 = vmatpush.msrb.mxu1 %v730_v55  ;;  %v778_v54 = vld [vmem:[#allocation2 + $0x1458] sm:$0xff]  ;;  %v795_v55 = vld [vmem:[#allocation2 + $0x14e0] sm:$0xff] }
 0x150   :  { %1627 = vmatpush.msrb.mxu2 %v745_v56  ;;  %1646 = vmatpush.msrb.mxu3 %v762_v57  ;;  %v810_v56 = vld [vmem:[#allocation2 + $0x1558] sm:$0xff]  ;;  %v827_v57 = vld [vmem:[#allocation2 + $0x15e0] sm:$0xff] }
 0x151   :  { %1588 = vmatpush.msrb.mxu0 %v712_v58  ;;  %1607 = vmatpush.msrb.mxu1 %v729_v59  ;;  %v777_v58 = vld [vmem:[#allocation2 + $0x1450] sm:$0xff]  ;;  %v794_v59 = vld [vmem:[#allocation2 + $0x14d8] sm:$0xff] }
 0x152   :  { %1628 = vmatpush.msrb.mxu2 %v744_v60  ;;  %1647 = vmatpush.msrb.mxu3 %v761_v61  ;;  %v809_v60 = vld [vmem:[#allocation2 + $0x1550] sm:$0xff]  ;;  %v826_v61 = vld [vmem:[#allocation2 + $0x15d8] sm:$0xff] }
 0x153   :  { %1589 = vmatpush.msrb.mxu0 %v711_v62  ;;  %1608 = vmatpush.msrb.mxu1 %v728_v63  ;;  %v776_v62 = vld [vmem:[#allocation2 + $0x1448] sm:$0xff]  ;;  %v793_v63 = vld [vmem:[#allocation2 + $0x14d0] sm:$0xff] }
 0x154   :  { %1629 = vmatpush.msrb.mxu2 %v743_v0  ;;  %1648 = vmatpush.msrb.mxu3 %v760_v1  ;;  %v808_v0 = vld [vmem:[#allocation2 + $0x1548] sm:$0xff]  ;;  %v825_v1 = vld [vmem:[#allocation2 + $0x15d0] sm:$0xff] }
 0x155   :  { %1590 = vmatpush.msrb.mxu0 %v710_v2  ;;  %1609 = vmatpush.msrb.mxu1 %v727_v3  ;;  %v775_v2 = vld [vmem:[#allocation2 + $0x1440] sm:$0xff]  ;;  %v792_v3 = vld [vmem:[#allocation2 + $0x14c8] sm:$0xff] }
 0x156   :  { %1630 = vmatpush.msrb.mxu2 %v742_v4  ;;  %1649 = vmatpush.msrb.mxu3 %v759_v5  ;;  %v807_v4 = vld [vmem:[#allocation2 + $0x1540] sm:$0xff]  ;;  %v824_v5 = vld [vmem:[#allocation2 + $0x15c8] sm:$0xff] }
 0x157   :  { %1591 = vmatpush.msrb.mxu0 %v709_v6  ;;  %1610 = vmatpush.msrb.mxu1 %v726_v7  ;;  %v774_v6 = vld [vmem:[#allocation2 + $0x1438] sm:$0xff]  ;;  %v791_v7 = vld [vmem:[#allocation2 + $0x14c0] sm:$0xff] }
 0x158   :  { %1631 = vmatpush.msrb.mxu2 %v741_v8  ;;  %1650 = vmatpush.msrb.mxu3 %v758_v9  ;;  %v806_v8 = vld [vmem:[#allocation2 + $0x1538] sm:$0xff]  ;;  %v823_v9 = vld [vmem:[#allocation2 + $0x15c0] sm:$0xff] }
 0x159   :  { %1592 = vmatpush.msrb.mxu0 %v708_v10  ;;  %1611 = vmatpush.msrb.mxu1 %v725_v11  ;;  %v773_v10 = vld [vmem:[#allocation2 + $0x1430] sm:$0xff]  ;;  %v790_v11 = vld [vmem:[#allocation2 + $0x14b8] sm:$0xff] }
 0x15a   :  { %1632 = vmatpush.msrb.mxu2 %v740_v12  ;;  %1651 = vmatpush.msrb.mxu3 %v757_v13  ;;  %v805_v12 = vld [vmem:[#allocation2 + $0x1530] sm:$0xff]  ;;  %v822_v13 = vld [vmem:[#allocation2 + $0x15b8] sm:$0xff] }
 0x15b   :  { %1593 = vmatpush.msrb.mxu0 %v707_v14  ;;  %1612 = vmatpush.msrb.mxu1 %v724_v15  ;;  %v772_v14 = vld [vmem:[#allocation2 + $0x1428] sm:$0xff]  ;;  %v789_v15 = vld [vmem:[#allocation2 + $0x14b0] sm:$0xff] }
 0x15c   :  { %1633 = vmatpush.msrb.mxu2 %v739_v16  ;;  %1652 = vmatpush.msrb.mxu3 %v756_v17  ;;  %v804_v16 = vld [vmem:[#allocation2 + $0x1528] sm:$0xff]  ;;  %v821_v17 = vld [vmem:[#allocation2 + $0x15b0] sm:$0xff] }
 0x15d   :  { %1594 = vmatpush.msrb.mxu0 %v706_v18  ;;  %1613 = vmatpush.msrb.mxu1 %v723_v19  ;;  %v771_v18 = vld [vmem:[#allocation2 + $0x1420] sm:$0xff]  ;;  %v788_v19 = vld [vmem:[#allocation2 + $0x14a8] sm:$0xff] }
 0x15e   :  { %1634 = vmatpush.msrb.mxu2 %v738_v20  ;;  %1653 = vmatpush.msrb.mxu3 %v755_v21  ;;  %v803_v20 = vld [vmem:[#allocation2 + $0x1520] sm:$0xff]  ;;  %v820_v21 = vld [vmem:[#allocation2 + $0x15a8] sm:$0xff] }
 0x15f   :  { %1595 = vmatpush.msrb.mxu0 %v705_v22  ;;  %1614 = vmatpush.msrb.mxu1 %v722_v23  ;;  %v770_v22 = vld [vmem:[#allocation2 + $0x1418] sm:$0xff]  ;;  %v787_v23 = vld [vmem:[#allocation2 + $0x14a0] sm:$0xff] }
 0x160   :  { %1635 = vmatpush.msrb.mxu2 %v737_v24  ;;  %1654 = vmatpush.msrb.mxu3 %v754_v25  ;;  %v802_v24 = vld [vmem:[#allocation2 + $0x1518] sm:$0xff]  ;;  %v819_v25 = vld [vmem:[#allocation2 + $0x15a0] sm:$0xff] }
 0x161   :  { %1596 = vmatpush.msrb.mxu0 %v704_v26  ;;  %1615 = vmatpush.msrb.mxu1 %v721_v27  ;;  %v769_v26 = vld [vmem:[#allocation2 + $0x1410] sm:$0xff]  ;;  %v786_v27 = vld [vmem:[#allocation2 + $0x1498] sm:$0xff] }
 0x162   :  { %1636 = vmatpush.msrb.mxu2 %v736_v28  ;;  %1655 = vmatpush.msrb.mxu3 %v753_v29  ;;  %v801_v28 = vld [vmem:[#allocation2 + $0x1510] sm:$0xff]  ;;  %v818_v29 = vld [vmem:[#allocation2 + $0x1598] sm:$0xff] }
 0x163   :  { %1597 = vmatpush.msrb.mxu0 %v703_v30  ;;  %1616 = vmatpush.msrb.mxu1 %v720_v31  ;;  %v768_v30 = vld [vmem:[#allocation2 + $0x1408] sm:$0xff]  ;;  %v785_v31 = vld [vmem:[#allocation2 + $0x1490] sm:$0xff] }
 0x164   :  { %1637 = vmatpush.msrb.mxu2 %v735_v32  ;;  %1656 = vmatpush.msrb.mxu3 %v752_v33  ;;  %v800_v32 = vld [vmem:[#allocation2 + $0x1508] sm:$0xff]  ;;  %v817_v33 = vld [vmem:[#allocation2 + $0x1590] sm:$0xff] }
 0x165   :  { %1598 = vmatmul.f32.vlgmr.msrb.gmra.mxu0 %v117_v34  ;;  %1638 = vmatmul.f32.vlgmr.msrb.gmra.mxu2 %v119_v35  ;;  %v767_v34 = vld [vmem:[#allocation2 + $0x1400] sm:$0xff]  ;;  %v784_v35 = vld [vmem:[#allocation2 + $0x1488] sm:$0xff] }
 0x166   :  { %1662 = vmatpush.msra.mxu0 %v782_v36  ;;  %1702 = vmatpush.msra.mxu2 %v814_v37  ;;  %v799_v36 = vld [vmem:[#allocation2 + $0x1500] sm:$0xff]  ;;  %v816_v37 = vld [vmem:[#allocation2 + $0x1588] sm:$0xff] }
 0x167   :  { %1617 = vmatpush.msrb.mxu1 %v719_v38  ;;  %1657 = vmatpush.msrb.mxu3 %v751_v39  ;;  %v121_v38 = vld [vmem:[%s2173_s0 + $0x140] sm:$0xff]  ;;  %v123_v39 = vld [vmem:[%s2173_s0 + $0x150] sm:$0xff] }
 0x168   :  { %1618 = vmatmul.f32.vlgmr.msrb.gmra.mxu1 %v118_v40  ;;  %1658 = vmatmul.f32.vlgmr.msrb.gmra.mxu3 %v120_v41  ;;  %v846_v40 = vld [vmem:[#allocation2 + $0x1678] sm:$0xff]  ;;  %v783_v41 = vld [vmem:[#allocation2 + $0x1480] sm:$0xff] }
 0x169   :  { %1663 = vmatpush.msra.mxu0 %v781_v42  ;;  %1682 = vmatpush.msra.mxu1 %v798_v43  ;;  %v815_v42 = vld [vmem:[#allocation2 + $0x1580] sm:$0xff]  ;;  %v122_v43 = vld [vmem:[%s2173_s0 + $0x148] sm:$0xff] }
 0x16a   :  { %1703 = vmatpush.msra.mxu2 %v813_v44  ;;  %1722 = vmatpush.msra.mxu3 %v830_v45  ;;  %v124_v44 = vld [vmem:[%s2173_s0 + $0x158] sm:$0xff]  ;;  %v845_v45 = vld [vmem:[#allocation2 + $0x1670] sm:$0xff] }
 0x16b   :  { %1664 = vmatpush.msra.mxu0 %v780_v46  ;;  %1683 = vmatpush.msra.mxu1 %v797_v47  ;;  %v855_v46 = vld [vmem:[#allocation2 + $0x16c0] sm:$0xff]  ;;  %v844_v47 = vld [vmem:[#allocation2 + $0x1668] sm:$0xff] }
 0x16c   :  { %1704 = vmatpush.msra.mxu2 %v812_v48  ;;  %1723 = vmatpush.msra.mxu3 %v829_v49  ;;  %v854_v48 = vld [vmem:[#allocation2 + $0x16b8] sm:$0xff]  ;;  %v843_v49 = vld [vmem:[#allocation2 + $0x1660] sm:$0xff] }
 0x16d   :  { %1665 = vmatpush.msra.mxu0 %v779_v50  ;;  %1684 = vmatpush.msra.mxu1 %v796_v51  ;;  %v853_v50 = vld [vmem:[#allocation2 + $0x16b0] sm:$0xff]  ;;  %v842_v51 = vld [vmem:[#allocation2 + $0x1658] sm:$0xff] }
 0x16e   :  { %1705 = vmatpush.msra.mxu2 %v811_v52  ;;  %1724 = vmatpush.msra.mxu3 %v828_v53  ;;  %v852_v52 = vld [vmem:[#allocation2 + $0x16a8] sm:$0xff]  ;;  %v841_v53 = vld [vmem:[#allocation2 + $0x1650] sm:$0xff] }
 0x16f   :  { %1666 = vmatpush.msra.mxu0 %v778_v54  ;;  %1685 = vmatpush.msra.mxu1 %v795_v55  ;;  %v851_v54 = vld [vmem:[#allocation2 + $0x16a0] sm:$0xff]  ;;  %v840_v55 = vld [vmem:[#allocation2 + $0x1648] sm:$0xff] }
 0x170   :  { %1706 = vmatpush.msra.mxu2 %v810_v56  ;;  %1725 = vmatpush.msra.mxu3 %v827_v57  ;;  %v850_v56 = vld [vmem:[#allocation2 + $0x1698] sm:$0xff]  ;;  %v839_v57 = vld [vmem:[#allocation2 + $0x1640] sm:$0xff] }
 0x171   :  { %1667 = vmatpush.msra.mxu0 %v777_v58  ;;  %1686 = vmatpush.msra.mxu1 %v794_v59  ;;  %v849_v58 = vld [vmem:[#allocation2 + $0x1690] sm:$0xff]  ;;  %v838_v59 = vld [vmem:[#allocation2 + $0x1638] sm:$0xff] }
 0x172   :  { %1707 = vmatpush.msra.mxu2 %v809_v60  ;;  %1726 = vmatpush.msra.mxu3 %v826_v61  ;;  %v848_v60 = vld [vmem:[#allocation2 + $0x1688] sm:$0xff] }
 0x173   :  { %1668 = vmatpush.msra.mxu0 %v776_v62  ;;  %1687 = vmatpush.msra.mxu1 %v793_v63  ;;  %v1879_v61 = vld [vmem:[#allocation7] ss:$0 sm:$0xff]  ;;  %v837_v62 = vld [vmem:[#allocation2 + $0x1630] sm:$0xff]  ;;  %v879_v63 = vpop.f32.mrf.mxu0 }
 0x174   :  { %1708 = vmatpush.msra.mxu2 %v808_v0  ;;  %1727 = vmatpush.msra.mxu3 %v825_v1  ;;  %v847_v0 = vld [vmem:[#allocation2 + $0x1680] sm:$0xff]  ;;  %v836_v1 = vld [vmem:[#allocation2 + $0x1628] sm:$0xff] }
 0x175   :  { %1669 = vmatpush.msra.mxu0 %v775_v2  ;;  %1688 = vmatpush.msra.mxu1 %v792_v3  ;;  %v126_v2 = vld [vmem:[%s2173_s0 + $0x168] sm:$0xff]  ;;  %v880_v3 = vadd.f32 %v1879_v61, %v879_v63  ;;  %v1798_v63 = vld [vmem:[#allocation4 + $0x68] sm:$0xff] }
 0x176   :  { %1709 = vmatpush.msra.mxu2 %v807_v4  ;;  %1728 = vmatpush.msra.mxu3 %v824_v5  ;;  %v835_v4 = vld [vmem:[#allocation2 + $0x1620] sm:$0xff]  ;;  %v899_v5 = vpop.f32.mrf.mxu1 }
 0x177   :  { %1670 = vmatpush.msra.mxu0 %v774_v6  ;;  %1689 = vmatpush.msra.mxu1 %v791_v7  ;;  %v834_v6 = vld [vmem:[#allocation2 + $0x1618] sm:$0xff]  ;;  %v900_v7 = vadd.f32 %v899_v5, %v880_v3 }
 0x178   :  { %1710 = vmatpush.msra.mxu2 %v806_v8  ;;  %1729 = vmatpush.msra.mxu3 %v823_v9  ;;  %v833_v8 = vld [vmem:[#allocation2 + $0x1610] sm:$0xff]  ;;  %v919_v9 = vpop.f32.mrf.mxu2 }
 0x179   :  { %1671 = vmatpush.msra.mxu0 %v773_v10  ;;  %1690 = vmatpush.msra.mxu1 %v790_v11  ;;  %v832_v10 = vld [vmem:[#allocation2 + $0x1608] sm:$0xff]  ;;  %v920_v11 = vadd.f32 %v919_v9, %v900_v7  ;;  %v1794_v9 = vld [vmem:[#allocation4 + $0x48] sm:$0xff] }
 0x17a   :  { %1711 = vmatpush.msra.mxu2 %v805_v12  ;;  %1730 = vmatpush.msra.mxu3 %v822_v13  ;;  %v831_v12 = vld [vmem:[#allocation2 + $0x1600] sm:$0xff]  ;;  %v939_v13 = vpop.f32.mrf.mxu3 }
 0x17b   :  { %1672 = vmatpush.msra.mxu0 %v772_v14  ;;  %1691 = vmatpush.msra.mxu1 %v789_v15  ;;  %v125_v14 = vld [vmem:[%s2173_s0 + $0x160] sm:$0xff]  ;;  %v940_v15 = vadd.f32 %v939_v13, %v920_v11  ;;  %v1793_v11 = vld [vmem:[#allocation4 + $0x40] sm:$0xff] }
 0x17c   :  { %1712 = vmatpush.msra.mxu2 %v804_v16  ;;  %1731 = vmatpush.msra.mxu3 %v821_v17  ;;  %v959_v16 = vpop.f32.mrf.mxu0  ;;  %v1792_v13 = vld [vmem:[#allocation4 + $0x38] sm:$0xff] }
 0x17d   :  { %1673 = vmatpush.msra.mxu0 %v771_v18  ;;  %1692 = vmatpush.msra.mxu1 %v788_v19  ;;  %v960_v17 = vadd.f32 %v959_v16, %v940_v15  ;;  %v1791_v16 = vld [vmem:[#allocation4 + $0x30] sm:$0xff] }
 0x17e   :  { %1713 = vmatpush.msra.mxu2 %v803_v20  ;;  %1732 = vmatpush.msra.mxu3 %v820_v21  ;;  %v979_v18 = vpop.f32.mrf.mxu1 }
 0x17f   :  { %1674 = vmatpush.msra.mxu0 %v770_v22  ;;  %1693 = vmatpush.msra.mxu1 %v787_v23  ;;  %v980_v19 = vadd.f32 %v979_v18, %v960_v17  ;;  %v1790_v18 = vld [vmem:[#allocation4 + $0x28] sm:$0xff] }
 0x180   :  { %1714 = vmatpush.msra.mxu2 %v802_v24  ;;  %1733 = vmatpush.msra.mxu3 %v819_v25  ;;  %v999_v20 = vpop.f32.mrf.mxu2 }
 0x181   :  { %1675 = vmatpush.msra.mxu0 %v769_v26  ;;  %1694 = vmatpush.msra.mxu1 %v786_v27  ;;  %v1000_v21 = vadd.f32 %v999_v20, %v980_v19  ;;  %v1789_v20 = vld [vmem:[#allocation4 + $0x20] sm:$0xff] }
 0x182   :  { %1715 = vmatpush.msra.mxu2 %v801_v28  ;;  %1734 = vmatpush.msra.mxu3 %v818_v29  ;;  %v1019_v22 = vpop.f32.mrf.mxu3 }
 0x183   :  { %1676 = vmatpush.msra.mxu0 %v768_v30  ;;  %1695 = vmatpush.msra.mxu1 %v785_v31  ;;  %v1020_v24 = vadd.f32 %v1019_v22, %v1000_v21 }
 0x184   :  { %1716 = vmatpush.msra.mxu2 %v800_v32  ;;  %1735 = vmatpush.msra.mxu3 %v817_v33  ;;  %v1039_v23 = vpop.f32.mrf.mxu0 }
 0x185   :  { %1677 = vmatpush.msra.mxu0 %v767_v34  ;;  %1696 = vmatpush.msra.mxu1 %v784_v35  ;;  %v1040_v25 = vadd.f32 %v1039_v23, %v1020_v24  ;;  %v1788_v24 = vld [vmem:[#allocation4 + $0x18] sm:$0xff] }
 0x186   :  { %1717 = vmatpush.msra.mxu2 %v799_v36  ;;  %1736 = vmatpush.msra.mxu3 %v816_v37  ;;  %v1059_v26 = vpop.f32.mrf.mxu1 }
 0x187   :  { %1678 = vmatmul.f32.vlgmr.msra.gmra.mxu0 %v121_v38  ;;  %1718 = vmatmul.f32.vlgmr.msra.gmra.mxu2 %v123_v39  ;;  %v1060_v28 = vadd.f32 %v1059_v26, %v1040_v25  ;;  %v1787_v26 = vld [vmem:[#allocation4 + $0x10] sm:$0xff] }
 0x188   :  { %1742 = vmatpush.msrb.mxu0 %v846_v40  ;;  %1697 = vmatpush.msra.mxu1 %v783_v41  ;;  %v1079_v27 = vpop.f32.mrf.mxu2 }
 0x189   :  { %1737 = vmatpush.msra.mxu3 %v815_v42  ;;  %1698 = vmatmul.f32.vlgmr.msra.gmra.mxu1 %v122_v43  ;;  %v1080_v29 = vadd.f32 %v1079_v27, %v1060_v28 }
 0x18a   :  { %1738 = vmatmul.f32.vlgmr.msra.gmra.mxu3 %v124_v44  ;;  %1743 = vmatpush.msrb.mxu0 %v845_v45  ;;  %v1099_v30 = vpop.f32.mrf.mxu3 }
 0x18b   :  { %1769 = vmatpush.msrb.mxu1 %v855_v46  ;;  %v1100_v32 = vadd.f32 %v1099_v30, %v1080_v29  ;;  %v1786_v29 = vld [vmem:[#allocation4 + $0x8] sm:$0xff]  ;;  %v1785_v30 = vld [vmem:[#allocation4] sm:$0xff] }
 0x18c   :  { %1744 = vmatpush.msrb.mxu0 %v844_v47  ;;  %v1119_v31 = vpop.f32.mrf.mxu0 }
 0x18d   :  { %1770 = vmatpush.msrb.mxu1 %v854_v48  ;;  %v1120_v33 = vadd.f32 %v1119_v31, %v1100_v32 }
 0x18e   :  { %1745 = vmatpush.msrb.mxu0 %v843_v49  ;;  %v1139_v34 = vpop.f32.mrf.mxu1 }
 0x18f   :  { %1771 = vmatpush.msrb.mxu1 %v853_v50  ;;  %v1140_v36 = vadd.f32 %v1139_v34, %v1120_v33  ;;  %v1841_v33 = vld [vmem:[#allocation6 + $0x78] sm:$0xff]  ;;  %v1840_v34 = vld [vmem:[#allocation6 + $0x70] sm:$0xff] }
 0x190   :  { %1746 = vmatpush.msrb.mxu0 %v842_v51  ;;  %v1159_v35 = vpop.f32.mrf.mxu2  ;;  %1844 = vmatpush.msrb.mxu3 %v1841_v33 }
 0x191   :  { %1772 = vmatpush.msrb.mxu1 %v852_v52  ;;  %v1160_v37 = vadd.f32 %v1159_v35, %v1140_v36 }
 0x192   :  { %1747 = vmatpush.msrb.mxu0 %v841_v53  ;;  %v1179_v38 = vpop.f32.mrf.mxu3  ;;  %1845 = vmatpush.msrb.mxu3 %v1840_v34 }
 0x193   :  { %1773 = vmatpush.msrb.mxu1 %v851_v54  ;;  %v1180_v40 = vadd.f32 %v1179_v38, %v1160_v37  ;;  %v1839_v37 = vld [vmem:[#allocation6 + $0x68] sm:$0xff] }
 0x194   :  { %1748 = vmatpush.msrb.mxu0 %v840_v55  ;;  %v1199_v39 = vpop.f32.mrf.mxu0  ;;  %1846 = vmatpush.msrb.mxu3 %v1839_v37 }
 0x195   :  { %1774 = vmatpush.msrb.mxu1 %v850_v56  ;;  %v1200_v41 = vadd.f32 %v1199_v39, %v1180_v40  ;;  %v1838_v39 = vld [vmem:[#allocation6 + $0x60] sm:$0xff] }
 0x196   :  { %1749 = vmatpush.msrb.mxu0 %v839_v57  ;;  %v1219_v42 = vpop.f32.mrf.mxu1  ;;  %1847 = vmatpush.msrb.mxu3 %v1838_v39 }
 0x197   :  { %1775 = vmatpush.msrb.mxu1 %v849_v58  ;;  %v1220_v44 = vadd.f32 %v1219_v42, %v1200_v41  ;;  %v1837_v41 = vld [vmem:[#allocation6 + $0x58] sm:$0xff] }
 0x198   :  { %1750 = vmatpush.msrb.mxu0 %v838_v59  ;;  %v1239_v43 = vpop.f32.mrf.mxu2  ;;  %1848 = vmatpush.msrb.mxu3 %v1837_v41 }
 0x199   :  { %1776 = vmatpush.msrb.mxu1 %v848_v60  ;;  %v1240_v45 = vadd.f32 %v1239_v43, %v1220_v44  ;;  %v1800_v60 = vld [vmem:[#allocation4 + $0x78] sm:$0xff]  ;;  %v1836_v44 = vld [vmem:[#allocation6 + $0x50] sm:$0xff] }
 0x19a   :  { %1751 = vmatpush.msrb.mxu0 %v837_v62  ;;  %v1259_v46 = vpop.f32.mrf.mxu3  ;;  %1803 = vmatpush.msrb.mxu2 %v1800_v60  ;;  %v1799_v62 = vld [vmem:[#allocation4 + $0x70] sm:$0xff] }
 0x19b   :  { %1777 = vmatpush.msrb.mxu1 %v847_v0  ;;  %v1260_v48 = vadd.f32 %v1259_v46, %v1240_v45  ;;  %v1835_v46 = vld [vmem:[#allocation6 + $0x48] sm:$0xff]  ;;  %1849 = vmatpush.msrb.mxu3 %v1836_v44 }
 0x19c   :  { %1752 = vmatpush.msrb.mxu0 %v836_v1  ;;  %1872 = vmatmul.msk.f32.vlgmr.msrb.gmra.mxu1 %vm858_vm0, %v126_v2  ;;  %v1279_v47 = vpop.f32.mrf.mxu0  ;;  %v1797_v2 = vld [vmem:[#allocation4 + $0x60] sm:$0xff] }
 0x19d   :  { %v1280_v49 = vadd.f32 %v1279_v47, %v1260_v48  ;;  %1804 = vmatpush.msrb.mxu2 %v1799_v62  ;;  %v1834_v48 = vld [vmem:[#allocation6 + $0x40] sm:$0xff]  ;;  %1850 = vmatpush.msrb.mxu3 %v1835_v46 }
 0x19e   :  { %1753 = vmatpush.msrb.mxu0 %v835_v4  ;;  %v1299_v50 = vpop.f32.mrf.mxu1  ;;  %v1796_v4 = vld [vmem:[#allocation4 + $0x58] sm:$0xff] }
 0x19f   :  { %v1300_v52 = vadd.f32 %v1299_v50, %v1280_v49  ;;  %1805 = vmatpush.msrb.mxu2 %v1798_v63  ;;  %1851 = vmatpush.msrb.mxu3 %v1834_v48 }
 0x1a0   :  { %1754 = vmatpush.msrb.mxu0 %v834_v6  ;;  %v1319_v51 = vpop.f32.mrf.mxu2  ;;  %v1795_v6 = vld [vmem:[#allocation4 + $0x50] sm:$0xff] }
 0x1a1   :  { %v1320_v53 = vadd.f32 %v1319_v51, %v1300_v52  ;;  %1806 = vmatpush.msrb.mxu2 %v1797_v2  ;;  %v1833_v51 = vld [vmem:[#allocation6 + $0x38] sm:$0xff] }
 0x1a2   :  { %1755 = vmatpush.msrb.mxu0 %v833_v8  ;;  %v1339_v54 = vpop.f32.mrf.mxu3  ;;  %1852 = vmatpush.msrb.mxu3 %v1833_v51 }
 0x1a3   :  { %v1340_v56 = vadd.f32 %v1339_v54, %v1320_v53  ;;  %1807 = vmatpush.msrb.mxu2 %v1796_v4  ;;  %v1832_v53 = vld [vmem:[#allocation6 + $0x30] sm:$0xff]  ;;  %v1827_v4 = vld [vmem:[#allocation6 + $0x8] sm:$0xff] }
 0x1a4   :  { %1756 = vmatpush.msrb.mxu0 %v832_v10  ;;  %v1359_v55 = vpop.f32.mrf.mxu0  ;;  %1853 = vmatpush.msrb.mxu3 %v1832_v53 }
 0x1a5   :  { %v1360_v57 = vadd.f32 %v1359_v55, %v1340_v56  ;;  %1808 = vmatpush.msrb.mxu2 %v1795_v6  ;;  %v1831_v55 = vld [vmem:[#allocation6 + $0x28] sm:$0xff]  ;;  %v1880_v6 = vld [vmem:[#allocation7 + $0x1] ss:$0 sm:$0xff] }
 0x1a6   :  { %1757 = vmatpush.msrb.mxu0 %v831_v12  ;;  %v1379_v58 = vpop.f32.mrf.mxu1  ;;  %1854 = vmatpush.msrb.mxu3 %v1831_v55 }
 0x1a7   :  { %1758 = vmatmul.f32.vlgmr.msrb.gmra.mxu0 %v125_v14  ;;  %v1380_v61 = vadd.f32 %v1379_v58, %v1360_v57  ;;  %1809 = vmatpush.msrb.mxu2 %v1794_v9  ;;  %v1830_v58 = vld [vmem:[#allocation6 + $0x20] sm:$0xff] }
 0x1a8   :  { %v1399_v59 = vpop.f32.mrf.mxu2  ;;  %1855 = vmatpush.msrb.mxu3 %v1830_v58 }
 0x1a9   :  { %v1400_v0 = vadd.f32 %v1399_v59, %v1380_v61  ;;  %1810 = vmatpush.msrb.mxu2 %v1793_v11  ;;  %v1829_v59 = vld [vmem:[#allocation6 + $0x18] sm:$0xff]  ;;  %v1881_v11 = vld [vmem:[#allocation7 + $0x2] ss:$0 sm:$0xff] }
 0x1aa   :  { %v1419_v1 = vpop.f32.mrf.mxu3  ;;  %1856 = vmatpush.msrb.mxu3 %v1829_v59 }
 0x1ab   :  { %v1420_v5 = vadd.f32 %v1419_v1, %v1400_v0  ;;  %1811 = vmatpush.msrb.mxu2 %v1792_v13 }
 0x1ac   :  { %v1439_v3 = vpop.f32.mrf.mxu0 }
 0x1ad   :  { %v1440_v7 = vadd.f32 %v1439_v3, %v1420_v5  ;;  %1812 = vmatpush.msrb.mxu2 %v1791_v16  ;;  %v1828_v3 = vld [vmem:[#allocation6 + $0x10] sm:$0xff]  ;;  %v1826_v5 = vld [vmem:[#allocation6] sm:$0xff] }
 0x1ae   :  { %v1459_v8 = vpop.f32.mrf.mxu1  ;;  %1857 = vmatpush.msrb.mxu3 %v1828_v3 }
 0x1af   :  { %v1460_v12 = vadd.f32 %v1459_v8, %v1440_v7  ;;  %1813 = vmatpush.msrb.mxu2 %v1790_v18 }
 0x1b0   :  { %v1479_v10 = vpop.f32.mrf.mxu2  ;;  %1858 = vmatpush.msrb.mxu3 %v1827_v4 }
 0x1b1   :  { %v1480_v14 = vadd.f32 %v1479_v10, %v1460_v12  ;;  %1814 = vmatpush.msrb.mxu2 %v1789_v20 }
 0x1b2   :  { %v1499_v15 = vpop.f32.mrf.mxu3  ;;  %1859 = vmatpush.msrb.mxu3 %v1826_v5 }
 0x1b3   :  { %v1500_v19 = vadd.f32 %v1499_v15, %v1480_v14  ;;  %1815 = vmatpush.msrb.mxu2 %v1788_v24 }
 0x1b5   :  { %1816 = vmatpush.msrb.mxu2 %v1787_v26 }
 0x1b7   :  { %1817 = vmatpush.msrb.mxu2 %v1786_v29 }
 0x1b9   :  { %1818 = vmatpush.msrb.mxu2 %v1785_v30 }
 0x1c0   :  { %v1519_v17 = vpop.f32.mrf.mxu0 }
 0x1c1   :  { %v1520_v21 = vadd.f32 %v1519_v17, %v1500_v19 }
 0x1c3   :  { %v1539_v22 = vpop.f32.mrf.mxu1 }
 0x1c4   :  { %v1540_v25 = vadd.f32 %v1539_v22, %v1520_v21 }
 0x1c6   :  { %v1559_v23 = vpop.f32.mrf.mxu2 }
 0x1c7   :  { %v1560_v27 = vadd.f32 %v1559_v23, %v1540_v25 }
 0x1c9   :  { %v1579_v28 = vpop.f32.mrf.mxu3 }
 0x1ca   :  { %v1580_v32 = vadd.f32 %v1579_v28, %v1560_v27 }
 0x1e2   :  { %v1599_v31 = vpop.f32.mrf.mxu0 }
 0x1e3   :  { %v1600_v35 = vadd.f32 %v1599_v31, %v1580_v32 }
 0x1e5   :  { %v1619_v36 = vpop.f32.mrf.mxu1 }
 0x1e6   :  { %v1620_v40 = vadd.f32 %v1619_v36, %v1600_v35 }
 0x1e8   :  { %v1639_v38 = vpop.f32.mrf.mxu2 }
 0x1e9   :  { %v1640_v42 = vadd.f32 %v1639_v38, %v1620_v40 }
 0x1eb   :  { %v1659_v43 = vpop.f32.mrf.mxu3 }
 0x1ec   :  { %v1660_v47 = vadd.f32 %v1659_v43, %v1640_v42 }
 0x204   :  { %v1679_v45 = vpop.f32.mrf.mxu0 }
 0x205   :  { %v1680_v49 = vadd.f32 %v1679_v45, %v1660_v47 }
 0x206   :  { %v1699_v50 = vpop.f32.mrf.mxu1 }
 0x207   :  { %v1700_v54 = vadd.f32 %v1699_v50, %v1680_v49 }
 0x20a   :  { %v1719_v52 = vpop.f32.mrf.mxu2 }
 0x20b   :  { %v1720_v56 = vadd.f32 %v1719_v52, %v1700_v54 }
 0x20d   :  { %v1739_v57 = vpop.f32.mrf.mxu3 }
 0x20e   :  { %v1740_v60 = vadd.f32 %v1739_v57, %v1720_v56 }
 0x219   :  { %v1779_v62 = vpop.f32.mrf.mxu1 }
 0x224   :  { %v1759_v61 = vpop.f32.mrf.mxu0 }
 0x225   :  { %v1760_v63 = vadd.f32 %v1759_v61, %v1740_v60 }
 0x227   :  { %v1780_v0 = vadd.f32 %v1779_v62, %v1760_v63 }
 0x229   :  { %vm1782_vm1 = vcmp.gt.f32.partialorder %v1780_v0, 0.0  ;;  %v1783_v1 = vmul.f32 0.01, %v1780_v0 }
 0x22b   :  { %v1784_v2 = vsel %vm1782_vm1, %v1780_v0, %v1783_v1 }
 0x22c   :  { %1819 = vmatmul.f32.vlgmr.msrb.gmra.mxu2 %v1784_v2 }
 0x2af   :  { %v1820_v7 = vpop.f32.mrf.mxu2 }
 0x2b0   :  { %v1821_v8 = vadd.f32 %v1880_v6, %v1820_v7 }
 0x2b2   :  { %vm1823_vm2 = vcmp.gt.f32.partialorder %v1821_v8, 0.0  ;;  %v1824_v9 = vmul.f32 0.01, %v1821_v8 }
 0x2b4   :  { %v1825_v10 = vsel %vm1823_vm2, %v1821_v8, %v1824_v9 }
 0x2b5   :  { %1860 = vmatmul.f32.vlgmr.msrb.gmra.mxu3 %v1825_v10 }
 0x338   :  { %v1861_v12 = vpop.f32.mrf.mxu3 }
 0x339   :  { %v1862_v13 = vadd.f32 %v1881_v11, %v1861_v12 }
 0x33b   :  { %1864 = vst [vmem:[%s2178_s5] sm:$0xff] %v1862_v13 }
 0x33c   :  { %1869 = vsyncpa [#allocation3], 1 }
 0x33d   :  { %1870 = vsyncpa [#allocation5], 1 }
 0x33e   :  { %1871 = vsyncpa [#allocation8], 1 }

</bundles_post_ra>
